<compile_context>
chip_gen: v6e
topology: v6e:2x2x1
jax: 0.10.0
libtpu: 0.0.40
codegen_flags: <defaults>
</compile_context>

<pallas_src>
import jax
import jax.numpy as jnp
import numpy as np
from jax.experimental import pallas as pl
from jax.experimental.pallas import tpu as pltpu

# ---- small, module-consistent hyper-parameters ----
B = 2
T = 16
IN_CHANNELS = 16
HIDDEN = 32
OUT_CHANNELS = 8
KERNEL_SIZE = 5
DILATION_RATE = 2
N_LAYERS = 3
GIN = 16

BT = B * T
MAXPAD = (DILATION_RATE ** (N_LAYERS - 1)) * (KERNEL_SIZE - 1) // 2   # = 8 (8-aligned)
OUT_LANES = 128                                                       # lane-dense output


def encoder_kernel(lens_ref,                        # scalar prefetch (SMEM) [B]
                   x_ref, g_ref, noise_ref,         # [BT,Cin], [BT,GIN], [BT,Cout]
                   w_pre_ref, b_pre_ref,            # [Cin,H], [1,H]
                   w_layer_ref, b_layer_ref,        # [2L, K*H+GIN, H], [2L,1,H]
                   w_rs_ref, b_rs_ref,              # [2L, H, H], [2L,1,H]
                   w_proj_ref, b_proj_ref,          # [2, H, Cout], [2,1,Cout]
                   out_ref):                        # [BT, 128] packed z|m|logs|mask|0
    H = HIDDEN
    K = KERNEL_SIZE
    C = OUT_CHANNELS

    # sequence_mask(x_lengths, T), flattened batch-major -> [BT, 1]
    t_idx = jax.lax.broadcasted_iota(jnp.int32, (T, 1), 0)
    mask = jnp.concatenate(
        [(t_idx < lens_ref[b]).astype(jnp.float32) for b in range(B)], axis=0)

    # pre: 1x1 conv (channels on lanes -> MXU matmul), masked
    h = (jnp.dot(x_ref[...], w_pre_ref[...],
                 preferred_element_type=jnp.float32) + b_pre_ref[...]) * mask

    g_bt = g_ref[...]                               # cond, already broadcast over time
    zpad = jnp.zeros((B, MAXPAD, H), jnp.float32)   # hoisted, reused every layer
    skip = jnp.zeros((BT, H), jnp.float32)

    for i in range(N_LAYERS):
        d = DILATION_RATE ** i
        p = d * (K - 1) // 2
        # zero-padded view of the hidden state (built in registers, 8-aligned pads)
        hp = jnp.concatenate([zpad, h.reshape(B, T, H), zpad], axis=1)  # [B, T+16, H]
        # im2col: K shifted taps ++ conditioning stacked along lanes -> [BT, K*H+GIN]
        taps = [hp[:, MAXPAD - p + k * d: MAXPAD - p + k * d + T, :].reshape(BT, H)
                for k in range(K)]
        xcat = jnp.concatenate(taps + [g_bt], axis=-1)                  # [BT, 176]
        # dilated conv + conditioning as one fused matmul per gate half
        pre_t = (jnp.dot(xcat, w_layer_ref[2 * i],
                         preferred_element_type=jnp.float32) + b_layer_ref[2 * i])
        pre_s = (jnp.dot(xcat, w_layer_ref[2 * i + 1],
                         preferred_element_type=jnp.float32) + b_layer_ref[2 * i + 1])
        # fused_add_tanh_sigmoid_multiply (EUP)
        acts = jnp.tanh(pre_t) * jax.nn.sigmoid(pre_s)                  # [BT, H]
        # res_skip 1x1 conv: skip half always; residual half except last layer
        skip = skip + (jnp.dot(acts, w_rs_ref[2 * i + 1],
                               preferred_element_type=jnp.float32)
                       + b_rs_ref[2 * i + 1])
        if i < N_LAYERS - 1:
            res = (jnp.dot(acts, w_rs_ref[2 * i],
                           preferred_element_type=jnp.float32) + b_rs_ref[2 * i])
            h = (h + res) * mask

    out = skip * mask
    # proj 1x1 conv; m / logs halves selected by a leading weight index
    m = (jnp.dot(out, w_proj_ref[0], preferred_element_type=jnp.float32)
         + b_proj_ref[0]) * mask
    logs = (jnp.dot(out, w_proj_ref[1], preferred_element_type=jnp.float32)
            + b_proj_ref[1]) * mask
    # z = (m + eps * exp(logs)) * mask   (eps supplied as an input, see TODO in main)
    z = (m + noise_ref[...] * jnp.exp(logs)) * mask

    # single lane-dense packed store: [z | m | logs | mask (bcast to C) | zeros]
    out_ref[...] = jnp.concatenate(
        [z, m, logs, jnp.broadcast_to(mask, (BT, C)),
         jnp.zeros((BT, OUT_LANES - 4 * C), jnp.float32)], axis=-1)


def _full_spec(shape):
    nd = len(shape)
    return pl.BlockSpec(shape, lambda i, lens, nd=nd: (0,) * nd)


def _pack_params(params):
    """Pre-pack / fuse the PyTorch-equivalent weights for the kernel layout."""
    L, K, H, C = N_LAYERS, KERNEL_SIZE, HIDDEN, OUT_CHANNELS
    # WN in_layers in im2col layout ((k, c)-ordered rows), split into
    # tanh(0)/sigmoid(1) halves, fused with the cond_layer slice per layer.
    w_in = params['w_in'].reshape(L, K, H, 2, H).transpose(0, 3, 1, 2, 4)
    w_in = w_in.reshape(L, 2, K * H, H)                                  # [L,2,K*H,H]
    w_cond = params['w_cond'].reshape(GIN, L, 2, H).transpose(1, 2, 0, 3)  # [L,2,GIN,H]
    w_layer = jnp.concatenate([w_in, w_cond], axis=2).reshape(2 * L, K * H + GIN, H)
    b_layer = (params['b_in'].reshape(L, 2, H)
               + params['b_cond'].reshape(L, 2, H)).reshape(2 * L, 1, H)
    # res(0)/skip(1) halves of the res_skip convs
    w_rs = params['w_rs'].reshape(L, H, 2, H).transpose(0, 2, 1, 3).reshape(2 * L, H, H)
    b_rs = params['b_rs'].reshape(2 * L, 1, H)
    # m(0)/logs(1) halves of the projection
    w_proj = params['w_proj'].reshape(H, 2, C).transpose(1, 0, 2)
    b_proj = params['b_proj'].reshape(2, 1, C)
    return (params['w_pre'], params['b_pre'], w_layer, b_layer, w_rs, b_rs,
            w_proj, b_proj)


@jax.jit
def encoder_forward(x_bct, x_lengths, g_bg1, params, noise_btc):
    # channels-last, batch flattened onto sublanes
    x_flat = jnp.transpose(x_bct, (0, 2, 1)).reshape(BT, IN_CHANNELS)
    g_bt = jnp.broadcast_to(g_bg1[:, :, 0][:, None, :], (B, T, GIN)).reshape(BT, GIN)
    noise_flat = noise_btc.reshape(BT, OUT_CHANNELS)
    in_arrays = (x_flat, g_bt, noise_flat) + _pack_params(params)

    grid_spec = pltpu.PrefetchScalarGridSpec(
        num_scalar_prefetch=1,
        grid=(1,),                                   # whole batch in one invocation
        in_specs=[_full_spec(a.shape) for a in in_arrays],
        out_specs=pl.BlockSpec((BT, OUT_LANES), lambda i, lens: (0, 0)),
    )
    packed = pl.pallas_call(
        encoder_kernel,
        grid_spec=grid_spec,
        out_shape=jax.ShapeDtypeStruct((BT, OUT_LANES), jnp.float32),
        compiler_params=pltpu.CompilerParams(
            dimension_semantics=("arbitrary",)),
    )(x_lengths, *in_arrays)

    packed = packed.reshape(B, T, OUT_LANES)
    C = OUT_CHANNELS
    z = packed[:, :, 0:C]
    m = packed[:, :, C:2 * C]
    logs = packed[:, :, 2 * C:3 * C]
    x_mask = packed[:, :, 3 * C:3 * C + 1]
    tr = lambda a: jnp.transpose(a, (0, 2, 1))
    return tr(z), tr(m), tr(logs), tr(x_mask)   # z,m,logs: [B,Cout,T]; mask: [B,1,T]


def init_params(key):
    # deterministic synthetic parameters; weight_norm is just a parametrization
    # of the effective conv weight, so plain weights are semantically identical.
    ks = jax.random.split(key, 10)
    s = 0.1
    w_pre = s * jax.random.normal(ks[0], (IN_CHANNELS, HIDDEN), jnp.float32)
    b_pre = s * jax.random.normal(ks[1], (1, HIDDEN), jnp.float32)
    w_cond = s * jax.random.normal(ks[2], (GIN, 2 * HIDDEN * N_LAYERS), jnp.float32)
    b_cond = s * jax.random.normal(ks[3], (1, 2 * HIDDEN * N_LAYERS), jnp.float32)
    w_in = s * jax.random.normal(ks[4], (N_LAYERS * KERNEL_SIZE, HIDDEN, 2 * HIDDEN), jnp.float32)
    b_in = s * jax.random.normal(ks[5], (N_LAYERS, 1, 2 * HIDDEN), jnp.float32)
    w_rs = s * jax.random.normal(ks[6], (N_LAYERS, HIDDEN, 2 * HIDDEN), jnp.float32)
    b_rs = s * jax.random.normal(ks[7], (N_LAYERS, 1, 2 * HIDDEN), jnp.float32)
    # last WN layer's res_skip conv only outputs the skip half in PyTorch;
    # emulate by zeroing the unused residual half of the stacked weights.
    w_rs = w_rs.at[N_LAYERS - 1, :, :HIDDEN].set(0.0)
    b_rs = b_rs.at[N_LAYERS - 1, :, :HIDDEN].set(0.0)
    w_proj = s * jax.random.normal(ks[8], (HIDDEN, 2 * OUT_CHANNELS), jnp.float32)
    b_proj = s * jax.random.normal(ks[9], (1, 2 * OUT_CHANNELS), jnp.float32)
    return dict(w_pre=w_pre, b_pre=b_pre, w_cond=w_cond, b_cond=b_cond,
                w_in=w_in, b_in=b_in, w_rs=w_rs, b_rs=b_rs,
                w_proj=w_proj, b_proj=b_proj)


def encoder_ref(x_bct, x_lengths, g_bg1, params, noise_btc):
    # pure-JAX reference mirroring the PyTorch forward, full-f32 matmuls so it is
    # directly comparable to the Pallas kernel's f32 MXU matmuls.
    PREC = jax.lax.Precision.HIGHEST
    x = jnp.transpose(x_bct, (0, 2, 1))
    g = g_bg1[:, :, 0]
    mask = (jnp.arange(T)[None, :, None] < x_lengths[:, None, None]).astype(jnp.float32)
    h = (jnp.einsum('btc,ch->bth', x, params['w_pre'], precision=PREC)
         + params['b_pre']) * mask
    g_all = jnp.einsum('bg,gh->bh', g, params['w_cond'], precision=PREC) + params['b_cond']
    skip = jnp.zeros_like(h)
    for i in range(N_LAYERS):
        d = DILATION_RATE ** i
        p = d * (KERNEL_SIZE - 1) // 2
        hp = jnp.pad(h, ((0, 0), (p, p), (0, 0)))
        acc = jnp.zeros((B, T, 2 * HIDDEN), jnp.float32) + params['b_in'][i]
        for k in range(KERNEL_SIZE):
            acc = acc + jnp.einsum('btc,ch->bth', hp[:, k * d:k * d + T, :],
                                   params['w_in'][i * KERNEL_SIZE + k], precision=PREC)
        acc = acc + g_all[:, None, i * 2 * HIDDEN:(i + 1) * 2 * HIDDEN]
        acts = jnp.tanh(acc[..., :HIDDEN]) * jax.nn.sigmoid(acc[..., HIDDEN:])
        rs = (jnp.einsum('bth,hc->btc', acts, params['w_rs'][i], precision=PREC)
              + params['b_rs'][i])
        if i < N_LAYERS - 1:
            h = (h + rs[..., :HIDDEN]) * mask
        skip = skip + rs[..., HIDDEN:]
    out = skip * mask
    stats = (jnp.einsum('bth,hc->btc', out, params['w_proj'], precision=PREC)
             + params['b_proj']) * mask
    m = stats[..., :OUT_CHANNELS]
    logs = stats[..., OUT_CHANNELS:]
    z = (m + noise_btc * jnp.exp(logs)) * mask
    tr = lambda a: jnp.transpose(a, (0, 2, 1))
    return tr(z), tr(m), tr(logs), tr(mask)


if __name__ == "__main__":
    key = jax.random.PRNGKey(0)
    k1, k2, k3, k4 = jax.random.split(key, 4)

    x = jax.random.normal(k1, (B, IN_CHANNELS, T), jnp.float32)      # NCW like PyTorch
    x_lengths = jnp.array([T, T - 5], jnp.int32)
    g = jax.random.normal(k2, (B, GIN, 1), jnp.float32)              # speaker embedding
    # TODO(synk): torch.randn_like is replaced by a deterministic, precomputed
    # standard-normal noise tensor passed into the kernel (same reparam math).
    noise = jax.random.normal(k3, (B, T, OUT_CHANNELS), jnp.float32)
    params = init_params(k4)

    z, m, logs, x_mask = encoder_forward(x, x_lengths, g, params, noise)
    jax.block_until_ready((z, m, logs, x_mask))

    z_r, m_r, logs_r, mask_r = encoder_ref(x, x_lengths, g, params, noise)
    np.testing.assert_allclose(np.asarray(mask_r), np.asarray(x_mask), atol=1e-6)
    # Tightened vs v1: the earlier 5e-2 slack was the Pallas f32 MXU matmul being
    # compared against XLA's default (bf16-pass) einsum; the reference now runs at
    # precision=HIGHEST, leaving only small transcendental-approximation deltas.
    np.testing.assert_allclose(np.asarray(m_r), np.asarray(m), rtol=1e-2, atol=5e-3)
    np.testing.assert_allclose(np.asarray(logs_r), np.asarray(logs), rtol=1e-2, atol=5e-3)
    np.testing.assert_allclose(np.asarray(z_r), np.asarray(z), rtol=1e-2, atol=5e-3)

    print("KERNEL_OK")
</pallas_src>

<mosaic_0001>
module attributes {stable_mosaic.version = 11 : i64} {
  func.func @encoder_kernel(%arg0: i32, %arg1: memref<2xi32, #tpu.memory_space<smem>>, %arg2: memref<32x16xf32, #tpu.memory_space<vmem>>, %arg3: memref<32x16xf32, #tpu.memory_space<vmem>>, %arg4: memref<32x8xf32, #tpu.memory_space<vmem>>, %arg5: memref<16x32xf32, #tpu.memory_space<vmem>>, %arg6: memref<1x32xf32, #tpu.memory_space<vmem>>, %arg7: memref<6x176x32xf32, #tpu.memory_space<vmem>>, %arg8: memref<6x1x32xf32, #tpu.memory_space<vmem>>, %arg9: memref<6x32x32xf32, #tpu.memory_space<vmem>>, %arg10: memref<6x1x32xf32, #tpu.memory_space<vmem>>, %arg11: memref<2x32x8xf32, #tpu.memory_space<vmem>>, %arg12: memref<2x1x8xf32, #tpu.memory_space<vmem>>, %arg13: memref<32x128xf32, #tpu.memory_space<vmem>>) attributes {dimension_semantics = [#tpu.dimension_semantics<arbitrary>], iteration_bounds = array<i64: 1>, scalar_prefetch = 1 : i64, scratch_operands = 0 : i64, tpu.core_type = #tpu.core_type<tc>, window_params = [{pipeline_mode = #tpu.pipeline_mode<synchronous>, transform_indices = @transform_0, window_bounds = array<i64: 32, 16>}, {pipeline_mode = #tpu.pipeline_mode<synchronous>, transform_indices = @transform_1, window_bounds = array<i64: 32, 16>}, {pipeline_mode = #tpu.pipeline_mode<synchronous>, transform_indices = @transform_2, window_bounds = array<i64: 32, 8>}, {pipeline_mode = #tpu.pipeline_mode<synchronous>, transform_indices = @transform_3, window_bounds = array<i64: 16, 32>}, {pipeline_mode = #tpu.pipeline_mode<synchronous>, transform_indices = @transform_4, window_bounds = array<i64: 1, 32>}, {pipeline_mode = #tpu.pipeline_mode<synchronous>, transform_indices = @transform_5, window_bounds = array<i64: 6, 176, 32>}, {pipeline_mode = #tpu.pipeline_mode<synchronous>, transform_indices = @transform_6, window_bounds = array<i64: 6, 1, 32>}, {pipeline_mode = #tpu.pipeline_mode<synchronous>, transform_indices = @transform_7, window_bounds = array<i64: 6, 32, 32>}, {pipeline_mode = #tpu.pipeline_mode<synchronous>, transform_indices = @transform_8, window_bounds = array<i64: 6, 1, 32>}, {pipeline_mode = #tpu.pipeline_mode<synchronous>, transform_indices = @transform_9, window_bounds = array<i64: 2, 32, 8>}, {pipeline_mode = #tpu.pipeline_mode<synchronous>, transform_indices = @transform_10, window_bounds = array<i64: 2, 1, 8>}, {pipeline_mode = #tpu.pipeline_mode<synchronous>, transform_indices = @transform_11, window_bounds = array<i64: 32, 128>}]} {
    %0 = tpu.iota {dimensions = array<i32: 0>} : vector<16x1xi32>
    %c0 = arith.constant 0 : index
    %1 = memref.load %arg1[%c0] : memref<2xi32, #tpu.memory_space<smem>>
    %2 = vector.broadcast %1 : i32 to vector<16x1xi32>
    %3 = arith.cmpi slt, %0, %2 : vector<16x1xi32>
    %4 = arith.extui %3 : vector<16x1xi1> to vector<16x1xi32>
    %5 = arith.sitofp %4 : vector<16x1xi32> to vector<16x1xf32>
    %c1 = arith.constant 1 : index
    %6 = memref.load %arg1[%c1] : memref<2xi32, #tpu.memory_space<smem>>
    %7 = vector.broadcast %6 : i32 to vector<16x1xi32>
    %8 = arith.cmpi slt, %0, %7 : vector<16x1xi32>
    %9 = arith.extui %8 : vector<16x1xi1> to vector<16x1xi32>
    %10 = arith.sitofp %9 : vector<16x1xi32> to vector<16x1xf32>
    %11 = tpu.concatenate %5, %10 in 0 : vector<16x1xf32>, vector<16x1xf32> -> vector<32x1xf32>
    %c0_0 = arith.constant 0 : index
    %c0_1 = arith.constant 0 : index
    %12 = vector.load %arg2[%c0_0, %c0_1] : memref<32x16xf32, #tpu.memory_space<vmem>>, vector<32x16xf32>
    %c0_2 = arith.constant 0 : index
    %c0_3 = arith.constant 0 : index
    %13 = vector.load %arg5[%c0_2, %c0_3] : memref<16x32xf32, #tpu.memory_space<vmem>>, vector<16x32xf32>
    %cst = arith.constant dense<0.000000e+00> : vector<32x32xf32>
    %14 = tpu.matmul %12, %13, %cst {dimension_numbers = #tpu.dot_dimension_numbers<[1], [0], [0], [1], [0, 0, 1, 1], [], []>} : vector<32x16xf32>, vector<16x32xf32>, vector<32x32xf32> -> vector<32x32xf32>
    %c0_4 = arith.constant 0 : index
    %c0_5 = arith.constant 0 : index
    %15 = vector.load %arg6[%c0_4, %c0_5] : memref<1x32xf32, #tpu.memory_space<vmem>>, vector<1x32xf32>
    %16 = vector.broadcast %15 : vector<1x32xf32> to vector<32x32xf32>
    %17 = arith.addf %14, %16 : vector<32x32xf32>
    %18 = vector.broadcast %11 : vector<32x1xf32> to vector<32x32xf32>
    %19 = arith.mulf %17, %18 : vector<32x32xf32>
    %c0_6 = arith.constant 0 : index
    %c0_7 = arith.constant 0 : index
    %20 = vector.load %arg3[%c0_6, %c0_7] : memref<32x16xf32, #tpu.memory_space<vmem>>, vector<32x16xf32>
    %cst_8 = arith.constant 0.000000e+00 : f32
    %21 = vector.broadcast %cst_8 : f32 to vector<2x8x32xf32>
    %cst_9 = arith.constant 0.000000e+00 : f32
    %22 = vector.broadcast %cst_9 : f32 to vector<32x32xf32>
    %23 = vector.shape_cast %19 : vector<32x32xf32> to vector<2x16x32xf32>
    %24 = tpu.concatenate %21, %23, %21 in 1 : vector<2x8x32xf32>, vector<2x16x32xf32>, vector<2x8x32xf32> -> vector<2x32x32xf32>
    %25 = vector.extract_strided_slice %24 {offsets = [0, 6, 0], sizes = [2, 16, 32], strides = [1, 1, 1]} : vector<2x32x32xf32> to vector<2x16x32xf32>
    %26 = vector.shape_cast %25 : vector<2x16x32xf32> to vector<32x32xf32>
    %27 = vector.extract_strided_slice %24 {offsets = [0, 7, 0], sizes = [2, 16, 32], strides = [1, 1, 1]} : vector<2x32x32xf32> to vector<2x16x32xf32>
    %28 = vector.shape_cast %27 : vector<2x16x32xf32> to vector<32x32xf32>
    %29 = vector.extract_strided_slice %24 {offsets = [0, 8, 0], sizes = [2, 16, 32], strides = [1, 1, 1]} : vector<2x32x32xf32> to vector<2x16x32xf32>
    %30 = vector.shape_cast %29 : vector<2x16x32xf32> to vector<32x32xf32>
    %31 = vector.extract_strided_slice %24 {offsets = [0, 9, 0], sizes = [2, 16, 32], strides = [1, 1, 1]} : vector<2x32x32xf32> to vector<2x16x32xf32>
    %32 = vector.shape_cast %31 : vector<2x16x32xf32> to vector<32x32xf32>
    %33 = vector.extract_strided_slice %24 {offsets = [0, 10, 0], sizes = [2, 16, 32], strides = [1, 1, 1]} : vector<2x32x32xf32> to vector<2x16x32xf32>
    %34 = vector.shape_cast %33 : vector<2x16x32xf32> to vector<32x32xf32>
    %35 = tpu.concatenate %26, %28, %30, %32, %34, %20 in 1 : vector<32x32xf32>, vector<32x32xf32>, vector<32x32xf32>, vector<32x32xf32>, vector<32x32xf32>, vector<32x16xf32> -> vector<32x176xf32>
    %c0_10 = arith.constant 0 : index
    %c0_11 = arith.constant 0 : index
    %c0_12 = arith.constant 0 : index
    %36 = vector.load %arg7[%c0_10, %c0_11, %c0_12] : memref<6x176x32xf32, #tpu.memory_space<vmem>>, vector<1x176x32xf32>
    %37 = vector.shape_cast %36 : vector<1x176x32xf32> to vector<176x32xf32>
    %cst_13 = arith.constant dense<0.000000e+00> : vector<32x32xf32>
    %38 = tpu.matmul %35, %37, %cst_13 {dimension_numbers = #tpu.dot_dimension_numbers<[1], [0], [0], [1], [0, 0, 1, 1], [], []>} : vector<32x176xf32>, vector<176x32xf32>, vector<32x32xf32> -> vector<32x32xf32>
    %c0_14 = arith.constant 0 : index
    %c0_15 = arith.constant 0 : index
    %c0_16 = arith.constant 0 : index
    %39 = vector.load %arg8[%c0_14, %c0_15, %c0_16] : memref<6x1x32xf32, #tpu.memory_space<vmem>>, vector<1x1x32xf32>
    %40 = vector.shape_cast %39 : vector<1x1x32xf32> to vector<1x32xf32>
    %41 = vector.broadcast %40 : vector<1x32xf32> to vector<32x32xf32>
    %42 = arith.addf %38, %41 : vector<32x32xf32>
    %c1_17 = arith.constant 1 : index
    %c0_18 = arith.constant 0 : index
    %c0_19 = arith.constant 0 : index
    %43 = vector.load %arg7[%c1_17, %c0_18, %c0_19] : memref<6x176x32xf32, #tpu.memory_space<vmem>>, vector<1x176x32xf32>
    %44 = vector.shape_cast %43 : vector<1x176x32xf32> to vector<176x32xf32>
    %cst_20 = arith.constant dense<0.000000e+00> : vector<32x32xf32>
    %45 = tpu.matmul %35, %44, %cst_20 {dimension_numbers = #tpu.dot_dimension_numbers<[1], [0], [0], [1], [0, 0, 1, 1], [], []>} : vector<32x176xf32>, vector<176x32xf32>, vector<32x32xf32> -> vector<32x32xf32>
    %c1_21 = arith.constant 1 : index
    %c0_22 = arith.constant 0 : index
    %c0_23 = arith.constant 0 : index
    %46 = vector.load %arg8[%c1_21, %c0_22, %c0_23] : memref<6x1x32xf32, #tpu.memory_space<vmem>>, vector<1x1x32xf32>
    %47 = vector.shape_cast %46 : vector<1x1x32xf32> to vector<1x32xf32>
    %48 = vector.broadcast %47 : vector<1x32xf32> to vector<32x32xf32>
    %49 = arith.addf %45, %48 : vector<32x32xf32>
    %50 = math.tanh %42 : vector<32x32xf32>
    %51 = arith.negf %49 : vector<32x32xf32>
    %52 = math.exp %51 : vector<32x32xf32>
    %cst_24 = arith.constant 1.000000e+00 : f32
    %53 = vector.broadcast %cst_24 : f32 to vector<32x32xf32>
    %54 = arith.addf %53, %52 : vector<32x32xf32>
    %55 = arith.divf %53, %54 : vector<32x32xf32>
    %56 = arith.mulf %50, %55 : vector<32x32xf32>
    %c1_25 = arith.constant 1 : index
    %c0_26 = arith.constant 0 : index
    %c0_27 = arith.constant 0 : index
    %57 = vector.load %arg9[%c1_25, %c0_26, %c0_27] : memref<6x32x32xf32, #tpu.memory_space<vmem>>, vector<1x32x32xf32>
    %58 = vector.shape_cast %57 : vector<1x32x32xf32> to vector<32x32xf32>
    %cst_28 = arith.constant dense<0.000000e+00> : vector<32x32xf32>
    %59 = tpu.matmul %56, %58, %cst_28 {dimension_numbers = #tpu.dot_dimension_numbers<[1], [0], [0], [1], [0, 0, 1, 1], [], []>} : vector<32x32xf32>, vector<32x32xf32>, vector<32x32xf32> -> vector<32x32xf32>
    %c1_29 = arith.constant 1 : index
    %c0_30 = arith.constant 0 : index
    %c0_31 = arith.constant 0 : index
    %60 = vector.load %arg10[%c1_29, %c0_30, %c0_31] : memref<6x1x32xf32, #tpu.memory_space<vmem>>, vector<1x1x32xf32>
    %61 = vector.shape_cast %60 : vector<1x1x32xf32> to vector<1x32xf32>
    %62 = vector.broadcast %61 : vector<1x32xf32> to vector<32x32xf32>
    %63 = arith.addf %59, %62 : vector<32x32xf32>
    %64 = arith.addf %22, %63 : vector<32x32xf32>
    %c0_32 = arith.constant 0 : index
    %c0_33 = arith.constant 0 : index
    %c0_34 = arith.constant 0 : index
    %65 = vector.load %arg9[%c0_32, %c0_33, %c0_34] : memref<6x32x32xf32, #tpu.memory_space<vmem>>, vector<1x32x32xf32>
    %66 = vector.shape_cast %65 : vector<1x32x32xf32> to vector<32x32xf32>
    %cst_35 = arith.constant dense<0.000000e+00> : vector<32x32xf32>
    %67 = tpu.matmul %56, %66, %cst_35 {dimension_numbers = #tpu.dot_dimension_numbers<[1], [0], [0], [1], [0, 0, 1, 1], [], []>} : vector<32x32xf32>, vector<32x32xf32>, vector<32x32xf32> -> vector<32x32xf32>
    %c0_36 = arith.constant 0 : index
    %c0_37 = arith.constant 0 : index
    %c0_38 = arith.constant 0 : index
    %68 = vector.load %arg10[%c0_36, %c0_37, %c0_38] : memref<6x1x32xf32, #tpu.memory_space<vmem>>, vector<1x1x32xf32>
    %69 = vector.shape_cast %68 : vector<1x1x32xf32> to vector<1x32xf32>
    %70 = vector.broadcast %69 : vector<1x32xf32> to vector<32x32xf32>
    %71 = arith.addf %67, %70 : vector<32x32xf32>
    %72 = arith.addf %19, %71 : vector<32x32xf32>
    %73 = vector.broadcast %11 : vector<32x1xf32> to vector<32x32xf32>
    %74 = arith.mulf %72, %73 : vector<32x32xf32>
    %75 = vector.shape_cast %74 : vector<32x32xf32> to vector<2x16x32xf32>
    %76 = tpu.concatenate %21, %75, %21 in 1 : vector<2x8x32xf32>, vector<2x16x32xf32>, vector<2x8x32xf32> -> vector<2x32x32xf32>
    %77 = vector.extract_strided_slice %76 {offsets = [0, 4, 0], sizes = [2, 16, 32], strides = [1, 1, 1]} : vector<2x32x32xf32> to vector<2x16x32xf32>
    %78 = vector.shape_cast %77 : vector<2x16x32xf32> to vector<32x32xf32>
    %79 = vector.extract_strided_slice %76 {offsets = [0, 6, 0], sizes = [2, 16, 32], strides = [1, 1, 1]} : vector<2x32x32xf32> to vector<2x16x32xf32>
    %80 = vector.shape_cast %79 : vector<2x16x32xf32> to vector<32x32xf32>
    %81 = vector.extract_strided_slice %76 {offsets = [0, 8, 0], sizes = [2, 16, 32], strides = [1, 1, 1]} : vector<2x32x32xf32> to vector<2x16x32xf32>
    %82 = vector.shape_cast %81 : vector<2x16x32xf32> to vector<32x32xf32>
    %83 = vector.extract_strided_slice %76 {offsets = [0, 10, 0], sizes = [2, 16, 32], strides = [1, 1, 1]} : vector<2x32x32xf32> to vector<2x16x32xf32>
    %84 = vector.shape_cast %83 : vector<2x16x32xf32> to vector<32x32xf32>
    %85 = vector.extract_strided_slice %76 {offsets = [0, 12, 0], sizes = [2, 16, 32], strides = [1, 1, 1]} : vector<2x32x32xf32> to vector<2x16x32xf32>
    %86 = vector.shape_cast %85 : vector<2x16x32xf32> to vector<32x32xf32>
    %87 = tpu.concatenate %78, %80, %82, %84, %86, %20 in 1 : vector<32x32xf32>, vector<32x32xf32>, vector<32x32xf32>, vector<32x32xf32>, vector<32x32xf32>, vector<32x16xf32> -> vector<32x176xf32>
    %c2 = arith.constant 2 : index
    %c0_39 = arith.constant 0 : index
    %c0_40 = arith.constant 0 : index
    %88 = vector.load %arg7[%c2, %c0_39, %c0_40] : memref<6x176x32xf32, #tpu.memory_space<vmem>>, vector<1x176x32xf32>
    %89 = vector.shape_cast %88 : vector<1x176x32xf32> to vector<176x32xf32>
    %cst_41 = arith.constant dense<0.000000e+00> : vector<32x32xf32>
    %90 = tpu.matmul %87, %89, %cst_41 {dimension_numbers = #tpu.dot_dimension_numbers<[1], [0], [0], [1], [0, 0, 1, 1], [], []>} : vector<32x176xf32>, vector<176x32xf32>, vector<32x32xf32> -> vector<32x32xf32>
    %c2_42 = arith.constant 2 : index
    %c0_43 = arith.constant 0 : index
    %c0_44 = arith.constant 0 : index
    %91 = vector.load %arg8[%c2_42, %c0_43, %c0_44] : memref<6x1x32xf32, #tpu.memory_space<vmem>>, vector<1x1x32xf32>
    %92 = vector.shape_cast %91 : vector<1x1x32xf32> to vector<1x32xf32>
    %93 = vector.broadcast %92 : vector<1x32xf32> to vector<32x32xf32>
    %94 = arith.addf %90, %93 : vector<32x32xf32>
    %c3 = arith.constant 3 : index
    %c0_45 = arith.constant 0 : index
    %c0_46 = arith.constant 0 : index
    %95 = vector.load %arg7[%c3, %c0_45, %c0_46] : memref<6x176x32xf32, #tpu.memory_space<vmem>>, vector<1x176x32xf32>
    %96 = vector.shape_cast %95 : vector<1x176x32xf32> to vector<176x32xf32>
    %cst_47 = arith.constant dense<0.000000e+00> : vector<32x32xf32>
    %97 = tpu.matmul %87, %96, %cst_47 {dimension_numbers = #tpu.dot_dimension_numbers<[1], [0], [0], [1], [0, 0, 1, 1], [], []>} : vector<32x176xf32>, vector<176x32xf32>, vector<32x32xf32> -> vector<32x32xf32>
    %c3_48 = arith.constant 3 : index
    %c0_49 = arith.constant 0 : index
    %c0_50 = arith.constant 0 : index
    %98 = vector.load %arg8[%c3_48, %c0_49, %c0_50] : memref<6x1x32xf32, #tpu.memory_space<vmem>>, vector<1x1x32xf32>
    %99 = vector.shape_cast %98 : vector<1x1x32xf32> to vector<1x32xf32>
    %100 = vector.broadcast %99 : vector<1x32xf32> to vector<32x32xf32>
    %101 = arith.addf %97, %100 : vector<32x32xf32>
    %102 = math.tanh %94 : vector<32x32xf32>
    %103 = arith.negf %101 : vector<32x32xf32>
    %104 = math.exp %103 : vector<32x32xf32>
    %cst_51 = arith.constant 1.000000e+00 : f32
    %105 = vector.broadcast %cst_51 : f32 to vector<32x32xf32>
    %106 = arith.addf %105, %104 : vector<32x32xf32>
    %107 = arith.divf %105, %106 : vector<32x32xf32>
    %108 = arith.mulf %102, %107 : vector<32x32xf32>
    %c3_52 = arith.constant 3 : index
    %c0_53 = arith.constant 0 : index
    %c0_54 = arith.constant 0 : index
    %109 = vector.load %arg9[%c3_52, %c0_53, %c0_54] : memref<6x32x32xf32, #tpu.memory_space<vmem>>, vector<1x32x32xf32>
    %110 = vector.shape_cast %109 : vector<1x32x32xf32> to vector<32x32xf32>
    %cst_55 = arith.constant dense<0.000000e+00> : vector<32x32xf32>
    %111 = tpu.matmul %108, %110, %cst_55 {dimension_numbers = #tpu.dot_dimension_numbers<[1], [0], [0], [1], [0, 0, 1, 1], [], []>} : vector<32x32xf32>, vector<32x32xf32>, vector<32x32xf32> -> vector<32x32xf32>
    %c3_56 = arith.constant 3 : index
    %c0_57 = arith.constant 0 : index
    %c0_58 = arith.constant 0 : index
    %112 = vector.load %arg10[%c3_56, %c0_57, %c0_58] : memref<6x1x32xf32, #tpu.memory_space<vmem>>, vector<1x1x32xf32>
    %113 = vector.shape_cast %112 : vector<1x1x32xf32> to vector<1x32xf32>
    %114 = vector.broadcast %113 : vector<1x32xf32> to vector<32x32xf32>
    %115 = arith.addf %111, %114 : vector<32x32xf32>
    %116 = arith.addf %64, %115 : vector<32x32xf32>
    %c2_59 = arith.constant 2 : index
    %c0_60 = arith.constant 0 : index
    %c0_61 = arith.constant 0 : index
    %117 = vector.load %arg9[%c2_59, %c0_60, %c0_61] : memref<6x32x32xf32, #tpu.memory_space<vmem>>, vector<1x32x32xf32>
    %118 = vector.shape_cast %117 : vector<1x32x32xf32> to vector<32x32xf32>
    %cst_62 = arith.constant dense<0.000000e+00> : vector<32x32xf32>
    %119 = tpu.matmul %108, %118, %cst_62 {dimension_numbers = #tpu.dot_dimension_numbers<[1], [0], [0], [1], [0, 0, 1, 1], [], []>} : vector<32x32xf32>, vector<32x32xf32>, vector<32x32xf32> -> vector<32x32xf32>
    %c2_63 = arith.constant 2 : index
    %c0_64 = arith.constant 0 : index
    %c0_65 = arith.constant 0 : index
    %120 = vector.load %arg10[%c2_63, %c0_64, %c0_65] : memref<6x1x32xf32, #tpu.memory_space<vmem>>, vector<1x1x32xf32>
    %121 = vector.shape_cast %120 : vector<1x1x32xf32> to vector<1x32xf32>
    %122 = vector.broadcast %121 : vector<1x32xf32> to vector<32x32xf32>
    %123 = arith.addf %119, %122 : vector<32x32xf32>
    %124 = arith.addf %74, %123 : vector<32x32xf32>
    %125 = vector.broadcast %11 : vector<32x1xf32> to vector<32x32xf32>
    %126 = arith.mulf %124, %125 : vector<32x32xf32>
    %127 = vector.shape_cast %126 : vector<32x32xf32> to vector<2x16x32xf32>
    %128 = tpu.concatenate %21, %127, %21 in 1 : vector<2x8x32xf32>, vector<2x16x32xf32>, vector<2x8x32xf32> -> vector<2x32x32xf32>
    %129 = vector.extract_strided_slice %128 {offsets = [0, 0, 0], sizes = [2, 16, 32], strides = [1, 1, 1]} : vector<2x32x32xf32> to vector<2x16x32xf32>
    %130 = vector.shape_cast %129 : vector<2x16x32xf32> to vector<32x32xf32>
    %131 = vector.extract_strided_slice %128 {offsets = [0, 4, 0], sizes = [2, 16, 32], strides = [1, 1, 1]} : vector<2x32x32xf32> to vector<2x16x32xf32>
    %132 = vector.shape_cast %131 : vector<2x16x32xf32> to vector<32x32xf32>
    %133 = vector.extract_strided_slice %128 {offsets = [0, 8, 0], sizes = [2, 16, 32], strides = [1, 1, 1]} : vector<2x32x32xf32> to vector<2x16x32xf32>
    %134 = vector.shape_cast %133 : vector<2x16x32xf32> to vector<32x32xf32>
    %135 = vector.extract_strided_slice %128 {offsets = [0, 12, 0], sizes = [2, 16, 32], strides = [1, 1, 1]} : vector<2x32x32xf32> to vector<2x16x32xf32>
    %136 = vector.shape_cast %135 : vector<2x16x32xf32> to vector<32x32xf32>
    %137 = vector.extract_strided_slice %128 {offsets = [0, 16, 0], sizes = [2, 16, 32], strides = [1, 1, 1]} : vector<2x32x32xf32> to vector<2x16x32xf32>
    %138 = vector.shape_cast %137 : vector<2x16x32xf32> to vector<32x32xf32>
    %139 = tpu.concatenate %130, %132, %134, %136, %138, %20 in 1 : vector<32x32xf32>, vector<32x32xf32>, vector<32x32xf32>, vector<32x32xf32>, vector<32x32xf32>, vector<32x16xf32> -> vector<32x176xf32>
    %c4 = arith.constant 4 : index
    %c0_66 = arith.constant 0 : index
    %c0_67 = arith.constant 0 : index
    %140 = vector.load %arg7[%c4, %c0_66, %c0_67] : memref<6x176x32xf32, #tpu.memory_space<vmem>>, vector<1x176x32xf32>
    %141 = vector.shape_cast %140 : vector<1x176x32xf32> to vector<176x32xf32>
    %cst_68 = arith.constant dense<0.000000e+00> : vector<32x32xf32>
    %142 = tpu.matmul %139, %141, %cst_68 {dimension_numbers = #tpu.dot_dimension_numbers<[1], [0], [0], [1], [0, 0, 1, 1], [], []>} : vector<32x176xf32>, vector<176x32xf32>, vector<32x32xf32> -> vector<32x32xf32>
    %c4_69 = arith.constant 4 : index
    %c0_70 = arith.constant 0 : index
    %c0_71 = arith.constant 0 : index
    %143 = vector.load %arg8[%c4_69, %c0_70, %c0_71] : memref<6x1x32xf32, #tpu.memory_space<vmem>>, vector<1x1x32xf32>
    %144 = vector.shape_cast %143 : vector<1x1x32xf32> to vector<1x32xf32>
    %145 = vector.broadcast %144 : vector<1x32xf32> to vector<32x32xf32>
    %146 = arith.addf %142, %145 : vector<32x32xf32>
    %c5 = arith.constant 5 : index
    %c0_72 = arith.constant 0 : index
    %c0_73 = arith.constant 0 : index
    %147 = vector.load %arg7[%c5, %c0_72, %c0_73] : memref<6x176x32xf32, #tpu.memory_space<vmem>>, vector<1x176x32xf32>
    %148 = vector.shape_cast %147 : vector<1x176x32xf32> to vector<176x32xf32>
    %cst_74 = arith.constant dense<0.000000e+00> : vector<32x32xf32>
    %149 = tpu.matmul %139, %148, %cst_74 {dimension_numbers = #tpu.dot_dimension_numbers<[1], [0], [0], [1], [0, 0, 1, 1], [], []>} : vector<32x176xf32>, vector<176x32xf32>, vector<32x32xf32> -> vector<32x32xf32>
    %c5_75 = arith.constant 5 : index
    %c0_76 = arith.constant 0 : index
    %c0_77 = arith.constant 0 : index
    %150 = vector.load %arg8[%c5_75, %c0_76, %c0_77] : memref<6x1x32xf32, #tpu.memory_space<vmem>>, vector<1x1x32xf32>
    %151 = vector.shape_cast %150 : vector<1x1x32xf32> to vector<1x32xf32>
    %152 = vector.broadcast %151 : vector<1x32xf32> to vector<32x32xf32>
    %153 = arith.addf %149, %152 : vector<32x32xf32>
    %154 = math.tanh %146 : vector<32x32xf32>
    %155 = arith.negf %153 : vector<32x32xf32>
    %156 = math.exp %155 : vector<32x32xf32>
    %cst_78 = arith.constant 1.000000e+00 : f32
    %157 = vector.broadcast %cst_78 : f32 to vector<32x32xf32>
    %158 = arith.addf %157, %156 : vector<32x32xf32>
    %159 = arith.divf %157, %158 : vector<32x32xf32>
    %160 = arith.mulf %154, %159 : vector<32x32xf32>
    %c5_79 = arith.constant 5 : index
    %c0_80 = arith.constant 0 : index
    %c0_81 = arith.constant 0 : index
    %161 = vector.load %arg9[%c5_79, %c0_80, %c0_81] : memref<6x32x32xf32, #tpu.memory_space<vmem>>, vector<1x32x32xf32>
    %162 = vector.shape_cast %161 : vector<1x32x32xf32> to vector<32x32xf32>
    %cst_82 = arith.constant dense<0.000000e+00> : vector<32x32xf32>
    %163 = tpu.matmul %160, %162, %cst_82 {dimension_numbers = #tpu.dot_dimension_numbers<[1], [0], [0], [1], [0, 0, 1, 1], [], []>} : vector<32x32xf32>, vector<32x32xf32>, vector<32x32xf32> -> vector<32x32xf32>
    %c5_83 = arith.constant 5 : index
    %c0_84 = arith.constant 0 : index
    %c0_85 = arith.constant 0 : index
    %164 = vector.load %arg10[%c5_83, %c0_84, %c0_85] : memref<6x1x32xf32, #tpu.memory_space<vmem>>, vector<1x1x32xf32>
    %165 = vector.shape_cast %164 : vector<1x1x32xf32> to vector<1x32xf32>
    %166 = vector.broadcast %165 : vector<1x32xf32> to vector<32x32xf32>
    %167 = arith.addf %163, %166 : vector<32x32xf32>
    %168 = arith.addf %116, %167 : vector<32x32xf32>
    %169 = vector.broadcast %11 : vector<32x1xf32> to vector<32x32xf32>
    %170 = arith.mulf %168, %169 : vector<32x32xf32>
    %c0_86 = arith.constant 0 : index
    %c0_87 = arith.constant 0 : index
    %c0_88 = arith.constant 0 : index
    %171 = vector.load %arg11[%c0_86, %c0_87, %c0_88] : memref<2x32x8xf32, #tpu.memory_space<vmem>>, vector<1x32x8xf32>
    %172 = vector.shape_cast %171 : vector<1x32x8xf32> to vector<32x8xf32>
    %cst_89 = arith.constant dense<0.000000e+00> : vector<32x8xf32>
    %173 = tpu.matmul %170, %172, %cst_89 {dimension_numbers = #tpu.dot_dimension_numbers<[1], [0], [0], [1], [0, 0, 1, 1], [], []>} : vector<32x32xf32>, vector<32x8xf32>, vector<32x8xf32> -> vector<32x8xf32>
    %c0_90 = arith.constant 0 : index
    %c0_91 = arith.constant 0 : index
    %c0_92 = arith.constant 0 : index
    %174 = vector.load %arg12[%c0_90, %c0_91, %c0_92] : memref<2x1x8xf32, #tpu.memory_space<vmem>>, vector<1x1x8xf32>
    %175 = vector.shape_cast %174 : vector<1x1x8xf32> to vector<1x8xf32>
    %176 = vector.broadcast %175 : vector<1x8xf32> to vector<32x8xf32>
    %177 = arith.addf %173, %176 : vector<32x8xf32>
    %178 = vector.broadcast %11 : vector<32x1xf32> to vector<32x8xf32>
    %179 = arith.mulf %177, %178 : vector<32x8xf32>
    %c1_93 = arith.constant 1 : index
    %c0_94 = arith.constant 0 : index
    %c0_95 = arith.constant 0 : index
    %180 = vector.load %arg11[%c1_93, %c0_94, %c0_95] : memref<2x32x8xf32, #tpu.memory_space<vmem>>, vector<1x32x8xf32>
    %181 = vector.shape_cast %180 : vector<1x32x8xf32> to vector<32x8xf32>
    %cst_96 = arith.constant dense<0.000000e+00> : vector<32x8xf32>
    %182 = tpu.matmul %170, %181, %cst_96 {dimension_numbers = #tpu.dot_dimension_numbers<[1], [0], [0], [1], [0, 0, 1, 1], [], []>} : vector<32x32xf32>, vector<32x8xf32>, vector<32x8xf32> -> vector<32x8xf32>
    %c1_97 = arith.constant 1 : index
    %c0_98 = arith.constant 0 : index
    %c0_99 = arith.constant 0 : index
    %183 = vector.load %arg12[%c1_97, %c0_98, %c0_99] : memref<2x1x8xf32, #tpu.memory_space<vmem>>, vector<1x1x8xf32>
    %184 = vector.shape_cast %183 : vector<1x1x8xf32> to vector<1x8xf32>
    %185 = vector.broadcast %184 : vector<1x8xf32> to vector<32x8xf32>
    %186 = arith.addf %182, %185 : vector<32x8xf32>
    %187 = vector.broadcast %11 : vector<32x1xf32> to vector<32x8xf32>
    %188 = arith.mulf %186, %187 : vector<32x8xf32>
    %c0_100 = arith.constant 0 : index
    %c0_101 = arith.constant 0 : index
    %189 = vector.load %arg4[%c0_100, %c0_101] : memref<32x8xf32, #tpu.memory_space<vmem>>, vector<32x8xf32>
    %190 = math.exp %188 : vector<32x8xf32>
    %191 = arith.mulf %189, %190 : vector<32x8xf32>
    %192 = arith.addf %179, %191 : vector<32x8xf32>
    %193 = vector.broadcast %11 : vector<32x1xf32> to vector<32x8xf32>
    %194 = arith.mulf %192, %193 : vector<32x8xf32>
    %195 = vector.shape_cast %11 : vector<32x1xf32> to vector<32x1xf32>
    %196 = vector.broadcast %195 : vector<32x1xf32> to vector<32x8xf32>
    %cst_102 = arith.constant 0.000000e+00 : f32
    %197 = vector.broadcast %cst_102 : f32 to vector<32x96xf32>
    %198 = tpu.concatenate %194, %179, %188, %196, %197 in 1 : vector<32x8xf32>, vector<32x8xf32>, vector<32x8xf32>, vector<32x8xf32>, vector<32x96xf32> -> vector<32x128xf32>
    %c0_103 = arith.constant 0 : index
    %c0_104 = arith.constant 0 : index
    %199 = vector.load %arg13[%c0_103, %c0_104] : memref<32x128xf32, #tpu.memory_space<vmem>>, vector<32x128xf32>
    tpu.vector_store %arg13[%c0_103, %c0_104], %198 {strides = array<i32>} : memref<32x128xf32, #tpu.memory_space<vmem>>, vector<32x128xf32>,
    return
  }
  func.func @transform_0(%arg0: i32, %arg1: memref<2xi32, #tpu.memory_space<smem>>) -> (i32, i32) {
    %c0_i32 = arith.constant 0 : i32
    %c0_i32_0 = arith.constant 0 : i32
    %c0_i32_1 = arith.constant 0 : i32
    return %c0_i32, %c0_i32_0 : i32, i32
  }
  func.func @transform_1(%arg0: i32, %arg1: memref<2xi32, #tpu.memory_space<smem>>) -> (i32, i32) {
    %c0_i32 = arith.constant 0 : i32
    %c0_i32_0 = arith.constant 0 : i32
    %c0_i32_1 = arith.constant 0 : i32
    return %c0_i32, %c0_i32_0 : i32, i32
  }
  func.func @transform_2(%arg0: i32, %arg1: memref<2xi32, #tpu.memory_space<smem>>) -> (i32, i32) {
    %c0_i32 = arith.constant 0 : i32
    %c0_i32_0 = arith.constant 0 : i32
    %c0_i32_1 = arith.constant 0 : i32
    return %c0_i32, %c0_i32_0 : i32, i32
  }
  func.func @transform_3(%arg0: i32, %arg1: memref<2xi32, #tpu.memory_space<smem>>) -> (i32, i32) {
    %c0_i32 = arith.constant 0 : i32
    %c0_i32_0 = arith.constant 0 : i32
    %c0_i32_1 = arith.constant 0 : i32
    return %c0_i32, %c0_i32_0 : i32, i32
  }
  func.func @transform_4(%arg0: i32, %arg1: memref<2xi32, #tpu.memory_space<smem>>) -> (i32, i32) {
    %c0_i32 = arith.constant 0 : i32
    %c0_i32_0 = arith.constant 0 : i32
    %c0_i32_1 = arith.constant 0 : i32
    return %c0_i32, %c0_i32_0 : i32, i32
  }
  func.func @transform_5(%arg0: i32, %arg1: memref<2xi32, #tpu.memory_space<smem>>) -> (i32, i32, i32) {
    %c0_i32 = arith.constant 0 : i32
    %c0_i32_0 = arith.constant 0 : i32
    %c0_i32_1 = arith.constant 0 : i32
    %c0_i32_2 = arith.constant 0 : i32
    return %c0_i32, %c0_i32_0, %c0_i32_1 : i32, i32, i32
  }
  func.func @transform_6(%arg0: i32, %arg1: memref<2xi32, #tpu.memory_space<smem>>) -> (i32, i32, i32) {
    %c0_i32 = arith.constant 0 : i32
    %c0_i32_0 = arith.constant 0 : i32
    %c0_i32_1 = arith.constant 0 : i32
    %c0_i32_2 = arith.constant 0 : i32
    return %c0_i32, %c0_i32_0, %c0_i32_1 : i32, i32, i32
  }
  func.func @transform_7(%arg0: i32, %arg1: memref<2xi32, #tpu.memory_space<smem>>) -> (i32, i32, i32) {
    %c0_i32 = arith.constant 0 : i32
    %c0_i32_0 = arith.constant 0 : i32
    %c0_i32_1 = arith.constant 0 : i32
    %c0_i32_2 = arith.constant 0 : i32
    return %c0_i32, %c0_i32_0, %c0_i32_1 : i32, i32, i32
  }
  func.func @transform_8(%arg0: i32, %arg1: memref<2xi32, #tpu.memory_space<smem>>) -> (i32, i32, i32) {
    %c0_i32 = arith.constant 0 : i32
    %c0_i32_0 = arith.constant 0 : i32
    %c0_i32_1 = arith.constant 0 : i32
    %c0_i32_2 = arith.constant 0 : i32
    return %c0_i32, %c0_i32_0, %c0_i32_1 : i32, i32, i32
  }
  func.func @transform_9(%arg0: i32, %arg1: memref<2xi32, #tpu.memory_space<smem>>) -> (i32, i32, i32) {
    %c0_i32 = arith.constant 0 : i32
    %c0_i32_0 = arith.constant 0 : i32
    %c0_i32_1 = arith.constant 0 : i32
    %c0_i32_2 = arith.constant 0 : i32
    return %c0_i32, %c0_i32_0, %c0_i32_1 : i32, i32, i32
  }
  func.func @transform_10(%arg0: i32, %arg1: memref<2xi32, #tpu.memory_space<smem>>) -> (i32, i32, i32) {
    %c0_i32 = arith.constant 0 : i32
    %c0_i32_0 = arith.constant 0 : i32
    %c0_i32_1 = arith.constant 0 : i32
    %c0_i32_2 = arith.constant 0 : i32
    return %c0_i32, %c0_i32_0, %c0_i32_1 : i32, i32, i32
  }
  func.func @transform_11(%arg0: i32, %arg1: memref<2xi32, #tpu.memory_space<smem>>) -> (i32, i32) {
    %c0_i32 = arith.constant 0 : i32
    %c0_i32_0 = arith.constant 0 : i32
    %c0_i32_1 = arith.constant 0 : i32
    return %c0_i32, %c0_i32_0 : i32, i32
  }
}

</mosaic_0001>

<bundles_post_ra>
// kernel: encoder_forward.1
= control target key start
LH: loop header
LB: loop body
LE: loop exit
PB: predicated region body
PF: predicated region fallthrough
CT: control target
= control target key end

     0   :  { %s3878_s0 = inlined_call_operand.vmem [shape: s32[2], index: 0, kind: input, shape index: {}]   ;;  %s3879_s1 = inlined_call_operand.vmem [shape: f32[32,16], index: 1, kind: input, shape index: {}]   ;;  %s3880_s2 = inlined_call_operand.vmem [shape: f32[32,16], index: 2, kind: input, shape index: {}]   ;;  %s3881_s3 = inlined_call_operand.vmem [shape: f32[32,8], index: 3, kind: input, shape index: {}]   ;;  %s3882_s4 = inlined_call_operand.vmem [shape: f32[16,32], index: 4, kind: input, shape index: {}]   ;;  %s3883_s5 = inlined_call_operand.vmem [shape: f32[1,32], index: 5, kind: input, shape index: {}]   ;;  %s3884_s6 = inlined_call_operand.vmem [shape: f32[6,176,32], index: 6, kind: input, shape index: {}]   ;;  %s3885_s7 = inlined_call_operand.vmem [shape: f32[6,1,32], index: 7, kind: input, shape index: {}]   ;;  %s3886_s8 = inlined_call_operand.vmem [shape: f32[6,32,32], index: 8, kind: input, shape index: {}]   ;;  %s3887_s9 = inlined_call_operand.vmem [shape: f32[6,1,32], index: 9, kind: input, shape index: {}]   ;;  %s3888_s10 = inlined_call_operand.vmem [shape: f32[2,32,8], index: 10, kind: input, shape index: {}]   ;;  %s3889_s11 = inlined_call_operand.vmem [shape: f32[2,1,8], index: 11, kind: input, shape index: {}]   ;;  %s3890_s12 = inlined_call_operand.vmem [shape: f32[32,128], index: 12, kind: output, shape index: {}]  }
   0x1   :  { %s17_s23 = sshll.u32 %s3878_s0, 4  ;;  %s18_s23 = int_to_ptr.vmem [resolvable:$true] %s17_s23 }
   0x2   :  { %s2704_s24 = scalar_lea.vmem %s18_s23, 16  ;;  %p2709_p1 = scmp.lt.s32.totalorder %s18_s23, %s18_s23 }
   0x3   :  { %p2705_p0 = scmp.ne.s32.totalorder %s18_s23, %s2704_s24  ;;  %p2710_p2 = scmp.lt.s32.totalorder %s2704_s24, %s2704_s24 }
   0x5   :  { %p2711_p3 = por %p2710_p2, %p2709_p1 }
   0x7   :  { %p2712_p4 = pnand %p2711_p3, %p2705_p0 }
   0x9   :  { %2715 = shalt.err (!%p2712_p4)  }
   0xa   :  { %s2718_s25 = smov [#allocation3]  }
   0xb   :  { %20 = dma.vmem_to_smem %s18_s23, 16, %s2718_s25, [#allocation2] }
   0xc   :  { %2716 = dma.done.wait [#allocation2], 16 }
   0xd   :  { %2717 = vsyncadd [#allocation2], 4294967280 }
   0xe   :  { %22 = sfence }
   0xf   :  { %v69_v0 = vld [vmem:[%s3882_s4 + $0x8] sm:$0xff]  ;;  %v68_v1 = vld [vmem:[%s3882_s4] sm:$0xff]  ;;  %vm77_vm0 = vcmask 130048   ;;  %v45_v3 = vlaneseq  ;;  %s48_s13 = sld [smem:[#allocation3]]  ;;  %v2719_v5 = vmov 0   ;;  %v66_v7 = vld [vmem:[%s3879_s1 + $0x10] sm:$0xff] }
  0x10   :  { %v64_v2 = vld [vmem:[%s3879_s1] sm:$0xff]  ;;  %2451 = vmatprep.subr.mxu0 %v69_v0  ;;  %v65_v4 = vld [vmem:[%s3879_s1 + $0x8] sm:$0xff]  ;;  %2567 = vset.pattern.permute.xlu0 %v2719_v5  ;;  %s2164_s16 = sld [smem:[#allocation3 + $0x1]]  ;;  %v2720_v9 = vmov 0.0   ;;  %v67_v10 = vld [vmem:[%s3879_s1 + $0x18] sm:$0xff]  ;;  %s2721_s21 = smov 32  }
  0x11   :  { %2455 = vmatprep.mubr.msk.f32.mxu0 %vm77_vm0, %v64_v2  ;;  %2452 = vmatpush3.msra.mxu0 %v69_v0  ;;  %v46_v6 = vshrl.u32 %v45_v3, 7  ;;  %v199_v17 = vld [vmem:[%s3880_s2] sm:$0xff]  ;;  %v342_v18 = vld [vmem:[%s3884_s6 + $0x78] sm:$0xff]  ;;  %v2192_v19 = vld [vmem:[%s3884_s6 + $0x128] sm:$0xff]  ;;  %vm242_vm5 = vcmask 1045504   ;;  %vm232_vm6 = vcmask 1046528  }
  0x12   :  { %2453 = vmatprep.subr.mxu0 %v68_v1  ;;  %2568 = vset.pattern.permute.xlu1 %v2719_v5  ;;  %v341_v20 = vld [vmem:[%s3884_s6 + $0x70] sm:$0xff]  ;;  %v2191_v21 = vld [vmem:[%s3884_s6 + $0x120] sm:$0xff]  ;;  %v340_v22 = vld [vmem:[%s3884_s6 + $0x68] sm:$0xff]  ;;  %vm308_vm7 = vcmask 261120   ;;  %vm222_vm8 = vcmask 1040384   ;;  %vm356_vm9 = vcmask 392192  }
  0x13   :  { %2454 = vmatpush3.msra.mxu0 %v68_v1  ;;  %v47_v8 = vadd.s32 8, %v46_v6  ;;  %369 = vmatprep.subr.mxu1 %v2720_v9  ;;  %v2190_v23 = vld [vmem:[%s3884_s6 + $0x118] sm:$0xff]  ;;  %v339_v24 = vld [vmem:[%s3884_s6 + $0x60] sm:$0xff]  ;;  %v2189_v25 = vld [vmem:[%s3884_s6 + $0x110] sm:$0xff]  ;;  %s2722_s30 = smov 64   ;;  %vm208_vm10 = vcmask 1041408  }
  0x14   :  { %2456 = vmatmul.mubr.msk.f32.vlgmr.msra.gmra.mxu0 %vm77_vm0, %v65_v4  ;;  %485 = vmatprep.subr.mxu0 %v2720_v9  ;;  %v338_v26 = vld [vmem:[%s3884_s6 + $0x58] sm:$0xff]  ;;  %v2188_v27 = vld [vmem:[%s3884_s6 + $0x108] sm:$0xff]  ;;  %v337_v28 = vld [vmem:[%s3884_s6 + $0x50] sm:$0xff]  ;;  %vm313_vm11 = vcmask 523264   ;;  %vm318_vm12 = vcmask 785408   ;;  %vm824_vm13 = vcmask 1043456  }
  0x15   :  { %2458 = vmatprep.mubr.msk.f32.mxu0 %vm77_vm0, %v66_v7  ;;  %v49_v11 = vstv %s48_s13  ;;  %370 = vmatpush1.msra.mxu1 %v342_v18  ;;  %v2187_v29 = vld [vmem:[%s3884_s6 + $0x100] sm:$0xff]  ;;  %v336_v30 = vld [vmem:[%s3884_s6 + $0x48] sm:$0xff]  ;;  %v2186_v31 = vld [vmem:[%s3884_s6 + $0xf8] sm:$0xff]  ;;  %s2723_s13 = smov 96   ;;  %s2724_s24 = smov 8   ;;  %vm2136_vm14 = vcmask 64512  }
  0x16   :  { %vm50_vm1 = vcmp.lt.s32.totalorder %v46_v6, %v49_v11  ;;  %vm51_vm2 = vcmp.lt.s32.totalorder %v47_v8, %v49_v11  ;;  %v57_v12 = vstv %s2164_s16  ;;  %486 = vmatpush1.msra.mxu0 %v2192_v19  ;;  %371 = vmatprep.subr.mxu1 %v2720_v9  ;;  %v335_v32 = vld [vmem:[%s3884_s6 + $0x40] sm:$0xff]  ;;  %v2185_v33 = vld [vmem:[%s3884_s6 + $0xf0] sm:$0xff]  ;;  %v334_v34 = vld [vmem:[%s3884_s6 + $0x38] sm:$0xff]  ;;  %vm2145_vm15 = vcmask 195584  }
  0x17   :  { %v2162_v13 = vsel %vm50_vm1, 1.0, %v2720_v9  ;;  %vm58_vm3 = vcmp.lt.s32.totalorder %v46_v6, %v57_v12  ;;  %vm59_vm4 = vcmp.lt.s32.totalorder %v47_v8, %v57_v12  ;;  %v2163_v15 = vsel %vm51_vm2, 1.0, %v2720_v9  ;;  %487 = vmatprep.subr.mxu0 %v2720_v9  ;;  %372 = vmatpush1.msra.mxu1 %v341_v20  ;;  %v2184_v35 = vld [vmem:[%s3884_s6 + $0xe8] sm:$0xff]  ;;  %v333_v36 = vld [vmem:[%s3884_s6 + $0x30] sm:$0xff]  ;;  %v2183_v37 = vld [vmem:[%s3884_s6 + $0xe0] sm:$0xff] }
  0x18   :  { %2459 = vmatmul.mubr.msk.f32.gmra.mxu0 %vm77_vm0, %v67_v10  ;;  %177 = vperm.xlu0 %2567, %v2162_v13   ;;  %v2165_v14 = vsel %vm58_vm3, 1.0, %v2720_v9  ;;  %v2166_v16 = vsel %vm59_vm4, 1.0, %v2720_v9  ;;  %v332_v38 = vld [vmem:[%s3884_s6 + $0x28] sm:$0xff]  ;;  %v2182_v39 = vld [vmem:[%s3884_s6 + $0xd8] sm:$0xff]  ;;  %v331_v40 = vld [vmem:[%s3884_s6 + $0x20] sm:$0xff]  ;;  %v236_v10 = vrot.slane %v2720_v9, 1 }
  0x19   :  { %187 = vperm.xlu1 %2568, %v2165_v14   ;;  %488 = vmatpush1.msra.mxu0 %v2191_v21  ;;  %v2181_v41 = vld [vmem:[%s3884_s6 + $0xd0] sm:$0xff]  ;;  %v330_v42 = vld [vmem:[%s3884_s6 + $0x18] sm:$0xff]  ;;  %v2180_v43 = vld [vmem:[%s3884_s6 + $0xc8] sm:$0xff]  ;;  %v223_v13 = vrot.slane %v2720_v9, 7 }
  0x1a   :  { %373 = vmatprep.subr.mxu1 %v2720_v9  ;;  %489 = vmatprep.subr.mxu0 %v2720_v9  ;;  %v329_v44 = vld [vmem:[%s3884_s6 + $0x10] sm:$0xff]  ;;  %v2179_v45 = vld [vmem:[%s3884_s6 + $0xc0] sm:$0xff]  ;;  %v328_v46 = vld [vmem:[%s3884_s6 + $0x8] sm:$0xff] }
  0x1b   :  { %374 = vmatpush1.msra.mxu1 %v340_v22  ;;  %490 = vmatpush1.msra.mxu0 %v2190_v23  ;;  %v2178_v47 = vld [vmem:[%s3884_s6 + $0xb8] sm:$0xff]  ;;  %v327_v48 = vld [vmem:[%s3884_s6] sm:$0xff]  ;;  %v2177_v49 = vld [vmem:[%s3884_s6 + $0xb0] sm:$0xff] }
  0x1c   :  { %182 = vperm.xlu0 %2567, %v2163_v15   ;;  %375 = vmatprep.subr.mxu1 %v2720_v9  ;;  %v348_v50 = vld [vmem:[%s3884_s6 + $0xa8] sm:$0xff]  ;;  %v2198_v51 = vld [vmem:[%s3884_s6 + $0x158] sm:$0xff]  ;;  %v347_v52 = vld [vmem:[%s3884_s6 + $0xa0] sm:$0xff] }
  0x1d   :  { %192 = vperm.xlu1 %2568, %v2166_v16   ;;  %491 = vmatprep.subr.mxu0 %v2720_v9  ;;  %v2197_v53 = vld [vmem:[%s3884_s6 + $0x150] sm:$0xff]  ;;  %v346_v55 = vld [vmem:[%s3884_s6 + $0x98] sm:$0xff]  ;;  %v2196_v56 = vld [vmem:[%s3884_s6 + $0x148] sm:$0xff] }
  0x1e   :  { %376 = vmatpush1.msra.mxu1 %v339_v24  ;;  %492 = vmatpush1.msra.mxu0 %v2189_v25  ;;  %v2167_v57 = vld [vmem:[%s3883_s5] ss:$0 sm:$0xff]  ;;  %v345_v59 = vld [vmem:[%s3884_s6 + $0x90] sm:$0xff]  ;;  %v344_v62 = vld [vmem:[%s3884_s6 + $0x88] sm:$0xff] }
  0x1f   :  { %377 = vmatprep.subr.mxu1 %v2720_v9  ;;  %493 = vmatprep.subr.mxu0 %v2720_v9  ;;  %v2195_v60 = vld [vmem:[%s3884_s6 + $0x140] sm:$0xff]  ;;  %v2194_v63 = vld [vmem:[%s3884_s6 + $0x138] sm:$0xff]  ;;  %v2193_v6 = vld [vmem:[%s3884_s6 + $0x130] sm:$0xff] }
  0x20   :  { %296 = vrot.lane.b32.xlu0 %v199_v17, %s2721_s21  ;;  %378 = vmatpush1.msra.mxu1 %v338_v26  ;;  %v343_v5 = vld [vmem:[%s3884_s6 + $0x80] sm:$0xff] }
  0x21   :  { %494 = vmatpush1.msra.mxu0 %v2188_v27  ;;  %379 = vmatprep.subr.mxu1 %v2720_v9 }
  0x22   :  { %495 = vmatprep.subr.mxu0 %v2720_v9  ;;  %380 = vmatpush1.msra.mxu1 %v337_v28 }
  0x23   :  { %496 = vmatpush1.msra.mxu0 %v2187_v29  ;;  %381 = vmatprep.subr.mxu1 %v2720_v9 }
  0x24   :  { %497 = vmatprep.subr.mxu0 %v2720_v9  ;;  %382 = vmatpush1.msra.mxu1 %v336_v30 }
  0x25   :  { %498 = vmatpush1.msra.mxu0 %v2186_v31  ;;  %383 = vmatprep.subr.mxu1 %v2720_v9 }
  0x26   :  { %499 = vmatprep.subr.mxu0 %v2720_v9  ;;  %384 = vmatpush1.msra.mxu1 %v335_v32 }
  0x27   :  { %500 = vmatpush1.msra.mxu0 %v2185_v33  ;;  %385 = vmatprep.subr.mxu1 %v2720_v9 }
  0x28   :  { %501 = vmatprep.subr.mxu0 %v2720_v9  ;;  %386 = vmatpush1.msra.mxu1 %v334_v34 }
  0x29   :  { %502 = vmatpush1.msra.mxu0 %v2184_v35  ;;  %387 = vmatprep.subr.mxu1 %v2720_v9 }
  0x2a   :  { %503 = vmatprep.subr.mxu0 %v2720_v9  ;;  %388 = vmatpush1.msra.mxu1 %v333_v36 }
  0x2b   :  { %504 = vmatpush1.msra.mxu0 %v2183_v37  ;;  %389 = vmatprep.subr.mxu1 %v2720_v9 }
  0x2c   :  { %505 = vmatprep.subr.mxu0 %v2720_v9  ;;  %390 = vmatpush1.msra.mxu1 %v332_v38  ;;  %v200_v38 = vld [vmem:[%s3880_s2 + $0x8] sm:$0xff] }
  0x2d   :  { %506 = vmatpush1.msra.mxu0 %v2182_v39  ;;  %391 = vmatprep.subr.mxu1 %v2720_v9 }
  0x2e   :  { %507 = vmatprep.subr.mxu0 %v2720_v9  ;;  %392 = vmatpush1.msra.mxu1 %v331_v40  ;;  %v201_v40 = vld [vmem:[%s3880_s2 + $0x10] sm:$0xff] }
  0x2f   :  { %508 = vmatpush1.msra.mxu0 %v2181_v41  ;;  %393 = vmatprep.subr.mxu1 %v2720_v9 }
  0x30   :  { %509 = vmatprep.subr.mxu0 %v2720_v9  ;;  %394 = vmatpush1.msra.mxu1 %v330_v42 }
  0x31   :  { %510 = vmatpush1.msra.mxu0 %v2180_v43  ;;  %395 = vmatprep.subr.mxu1 %v2720_v9 }
  0x32   :  { %511 = vmatprep.subr.mxu0 %v2720_v9  ;;  %396 = vmatpush1.msra.mxu1 %v329_v44  ;;  %v202_v44 = vld [vmem:[%s3880_s2 + $0x18] sm:$0xff] }
  0x33   :  { %512 = vmatpush1.msra.mxu0 %v2179_v45  ;;  %397 = vmatprep.subr.mxu1 %v2720_v9 }
  0x34   :  { %513 = vmatprep.subr.mxu0 %v2720_v9  ;;  %398 = vmatpush1.msra.mxu1 %v328_v46 }
  0x35   :  { %514 = vmatpush1.msra.mxu0 %v2178_v47  ;;  %399 = vmatprep.subr.mxu1 %v2720_v9 }
  0x36   :  { %515 = vmatprep.subr.mxu0 %v2720_v9  ;;  %400 = vmatpush1.msra.mxu1 %v327_v48  ;;  %v3076_v48 = vrot.slane %v2720_v9, 6 }
  0x37   :  { %516 = vmatpush1.msra.mxu0 %v2177_v49  ;;  %421 = vmatprep.subr.mxu1 %v2720_v9 }
  0x38   :  { %537 = vmatprep.subr.mxu0 %v2720_v9  ;;  %422 = vmatpush2.msra.mxu1 %v348_v50  ;;  %v3080_v50 = vrot.slane %v2720_v9, 2 }
  0x39   :  { %538 = vmatpush2.msra.mxu0 %v2198_v51  ;;  %423 = vmatprep.subr.mxu1 %v2720_v9 }
  0x3a   :  { %539 = vmatprep.subr.mxu0 %v2720_v9  ;;  %424 = vmatpush2.msra.mxu1 %v347_v52 }
  0x3b   :  { %540 = vmatpush2.msra.mxu0 %v2197_v53  ;;  %425 = vmatprep.subr.mxu1 %v2720_v9 }
  0x3c   :  { %541 = vmatprep.subr.mxu0 %v2720_v9  ;;  %426 = vmatpush2.msra.mxu1 %v346_v55 }
  0x3d   :  { %542 = vmatpush2.msra.mxu0 %v2196_v56  ;;  %427 = vmatprep.subr.mxu1 %v2720_v9 }
  0x3e   :  { %543 = vmatprep.subr.mxu0 %v2720_v9  ;;  %428 = vmatpush2.msra.mxu1 %v345_v59 }
  0x3f   :  { %544 = vmatpush2.msra.mxu0 %v2195_v60  ;;  %429 = vmatprep.subr.mxu1 %v2720_v9 }
  0x40   :  { %545 = vmatprep.subr.mxu0 %v2720_v9  ;;  %430 = vmatpush2.msra.mxu1 %v344_v62 }
  0x41   :  { %546 = vmatpush2.msra.mxu0 %v2194_v63  ;;  %431 = vmatprep.subr.mxu1 %v2720_v9 }
  0x42   :  { %547 = vmatprep.subr.mxu0 %v2720_v9  ;;  %432 = vmatpush2.msra.mxu1 %v343_v5 }
  0x43   :  { %548 = vmatpush2.msra.mxu0 %v2193_v6 }
  0x93   :  { %v2970_v54 = vpop.permute.xlu0 %177 }
  0x94   :  { %v2981_v58 = vpop.permute.xlu1 %187 }
  0x97   :  { %v2999_v1 = vpop.permute.xlu0 %182 }
  0x98   :  { %v3012_v8 = vpop.permute.xlu1 %192 }
  0x9b   :  { %v3026_v20 = vpop.permute.xlu0 %296 }
  0xd4   :  { %v2457_v61 = vpop.f32.mrf.mxu0 }
  0xd5   :  { %v162_v0 = vadd.f32 %v2457_v61, %v2167_v57 }
  0xd6   :  { %v156_v2 = vpop.f32.mrf.mxu0 }
  0xd7   :  { %v3002_v3 = vmul.f32 %v2999_v1, %v162_v0  ;;  %v157_v4 = vadd.f32 %v2167_v57, %v156_v2 }
  0xd8   :  { %v2460_v7 = vpop.f32.mrf.mxu0 }
  0xd9   :  { %v3016_v11 = vmul.f32 %v2970_v54, %v157_v4  ;;  %v172_v12 = vadd.f32 %v2460_v7, %v2167_v57  ;;  %v244_v15 = vrot.slane %v3002_v3, 2  ;;  %v234_v16 = vrot.slane %v3002_v3, 1 }
  0xda   :  { %v166_v14 = vpop.f32.mrf.mxu0  ;;  %v226_v23 = vrot.slane %v3002_v3, 7  ;;  %v212_v53 = vrot.slane %v3002_v3, 6 }
  0xdb   :  { %v167_v17 = vadd.f32 %v2167_v57, %v166_v14  ;;  %v3022_v18 = vmul.f32 %v3012_v8, %v172_v12  ;;  %v2569_v19 = vpack.i.bf16 %v3002_v3, %v3016_v11  ;;  %v243_v21 = vrot.slane %v3016_v11, 2 }
  0xdc   :  { %v224_v22 = vrot.slane %v3016_v11, 7  ;;  %v233_v24 = vrot.slane %v3016_v11, 1  ;;  %v237_v27 = vsel %vm232_vm6, %v234_v16, %v236_v10  ;;  %v210_v49 = vrot.slane %v3016_v11, 6 }
  0xdd   :  { %v3033_v25 = vmul.f32 %v2981_v58, %v167_v17  ;;  %2570 = vrot.lane.b32.xlu1 %v2569_v19, %s2722_s30  ;;  %v245_v26 = vsel %vm242_vm5, %v243_v21, %v244_v15  ;;  %v230_v28 = vrot.slane %v3022_v18, 7  ;;  %v239_v43 = vrot.slane %v3022_v18, 1 }
  0xde   :  { %v323_v29 = vsel %vm308_vm7, %v245_v26, %v3026_v20  ;;  %v225_v30 = vsel %vm222_vm8, %v223_v13, %v224_v22  ;;  %v227_v31 = vsel %vm222_vm8, %v224_v22, %v226_v23  ;;  %v235_v32 = vsel %vm232_vm6, %v233_v24, %v234_v16 }
  0xdf   :  { %2173 = vmatprep.mubr.msk.f32.mxu1 %vm356_vm9, %v323_v29  ;;  %2201 = vmatprep.mubr.msk.f32.mxu0 %vm356_vm9, %v323_v29  ;;  %v2574_v33 = vpack.i.bf16 %v227_v31, %v225_v30  ;;  %v2579_v34 = vpack.i.bf16 %v237_v27, %v235_v32  ;;  %v228_v35 = vrot.slane %v3033_v25, 7  ;;  %v2584_v41 = vpack.i.bf16 %v3022_v18, %v3033_v25 }
  0xe0   :  { %v238_v42 = vrot.slane %v3033_v25, 1  ;;  %v241_v46 = vsel %vm232_vm6, %v239_v43, %v236_v10  ;;  %v211_v60 = vsel %vm208_vm10, %v3076_v48, %v210_v49  ;;  %v213_v61 = vsel %vm208_vm10, %v210_v49, %v212_v53  ;;  %v2210_v49 = vld [vmem:[%s3886_s8 + $0x28] sm:$0xff]  ;;  %v2200_v53 = vld [vmem:[%s3885_s7 + $0x1] ss:$0 sm:$0xff] }
  0xe1   :  { %2575 = vrot.lane.b32.xlu0 %v2574_v33, %s2721_s21  ;;  %2580 = vrot.lane.b32.xlu1 %v2579_v34, %s2723_s13  ;;  %v229_v36 = vsel %vm222_vm8, %v223_v13, %v228_v35  ;;  %v231_v37 = vsel %vm222_vm8, %v228_v35, %v230_v28  ;;  %v247_v63 = vsel %vm242_vm5, %v244_v15, %v3080_v50  ;;  %v248_v7 = vrot.slane %v3033_v25, 2 }
  0xe2   :  { %v2589_v39 = vpack.i.bf16 %v231_v37, %v229_v36  ;;  %v240_v45 = vsel %vm232_vm6, %v238_v42, %v239_v43  ;;  %v249_v10 = vrot.slane %v3022_v18, 2  ;;  %v214_v15 = vrot.slane %v3033_v25, 6  ;;  %v719_v43 = vld [vmem:[%s3886_s8 + $0x18] sm:$0xff] }
  0xe3   :  { %v216_v29 = vrot.slane %v3022_v18, 6  ;;  %2475 = vmatprep.subr.mxu0 %v719_v43 }
  0xe4   :  { %v250_v22 = vsel %vm242_vm5, %v248_v7, %v249_v10  ;;  %v215_v27 = vsel %vm208_vm10, %v3076_v48, %v214_v15  ;;  %v251_v35 = vsel %vm242_vm5, %v249_v10, %v3080_v50 }
  0xe5   :  { %298 = vrot.lane.b32.xlu0 %v200_v38, %s2721_s21  ;;  %2590 = vrot.lane.b32.xlu1 %v2589_v39, %s2721_s21  ;;  %v217_v38 = vsel %vm208_vm10, %v214_v15, %v216_v29 }
  0xe9   :  { %2585 = vrot.lane.b32.xlu0 %v2584_v41, %s2722_s30  ;;  %300 = vrot.lane.b32.xlu1 %v201_v40, %s2721_s21 }
  0xed   :  { %284 = vrot.lane.b32.xlu0 %v240_v45, %s2723_s13  ;;  %302 = vrot.lane.b32.xlu1 %v202_v44, %s2721_s21  ;;  %v718_v44 = vld [vmem:[%s3886_s8 + $0x10] sm:$0xff]  ;;  %v2212_v45 = vld [vmem:[%s3886_s8 + $0x38] sm:$0xff] }
  0xee   :  { %2461 = vmatprep.subr.mxu1 %v2212_v45 }
  0xf1   :  { %286 = vrot.lane.b32.xlu0 %v241_v46, %s2723_s13  ;;  %v2211_v46 = vld [vmem:[%s3886_s8 + $0x30] sm:$0xff] }
 0x14f   :  { %v2571_v47 = vpop.permute.xlu1 %2570 }
 0x150   :  { %v2572_v59 = vunpack.i.l.bf16 %v2571_v47  ;;  %v2573_v2 = vunpack.i.h.bf16 %v2571_v47  ;;  %v717_v47 = vld [vmem:[%s3886_s8 + $0x8] sm:$0xff] }
 0x153   :  { %v2576_v51 = vpop.permute.xlu0 %2575  ;;  %v2581_v52 = vpop.permute.xlu1 %2580 }
 0x154   :  { %v2578_v55 = vunpack.i.h.bf16 %v2576_v51  ;;  %v2577_v56 = vunpack.i.l.bf16 %v2576_v51  ;;  %v2582_v57 = vunpack.i.l.bf16 %v2581_v52  ;;  %v2583_v12 = vunpack.i.h.bf16 %v2581_v52  ;;  %v716_v51 = vld [vmem:[%s3886_s8] sm:$0xff] }
 0x155   :  { %v2209_v52 = vld [vmem:[%s3886_s8 + $0x20] sm:$0xff] }
 0x156   :  { %v309_v62 = vsel %vm308_vm7, %v211_v60, %v2577_v56  ;;  %v310_v0 = vsel %vm308_vm7, %v213_v61, %v2578_v55 }
 0x157   :  { %v3092_v4 = vpop.permute.xlu0 %298  ;;  %v2591_v5 = vpop.permute.xlu1 %2590  ;;  %v314_v6 = vsel %vm313_vm11, %v309_v62, %v2572_v59  ;;  %v315_v17 = vsel %vm313_vm11, %v310_v0, %v2573_v2 }
 0x158   :  { %v319_v13 = vsel %vm318_vm12, %v314_v6, %v2582_v57  ;;  %v324_v14 = vsel %vm308_vm7, %v247_v63, %v3092_v4  ;;  %v2592_v16 = vunpack.i.l.bf16 %v2591_v5  ;;  %v320_v24 = vsel %vm318_vm12, %v315_v17, %v2583_v12 }
 0x159   :  { %434 = vmatmul.mubr.f32.vlgmr.msra.gmra.mxu1 %v319_v13  ;;  %550 = vmatmul.mubr.f32.vlgmr.msra.gmra.mxu0 %v319_v13  ;;  %v2593_v30 = vunpack.i.h.bf16 %v2591_v5 }
 0x15a   :  { %2174 = vmatprep.mubr.msk.f32.mxu1 %vm356_vm9, %v324_v14  ;;  %2202 = vmatprep.mubr.msk.f32.mxu0 %vm356_vm9, %v324_v14  ;;  %v311_v28 = vsel %vm308_vm7, %v215_v27, %v2592_v16 }
 0x15b   :  { %v2586_v19 = vpop.permute.xlu0 %2585  ;;  %v3104_v21 = vpop.permute.xlu1 %300  ;;  %v312_v39 = vsel %vm308_vm7, %v217_v38, %v2593_v30  ;;  %2476 = vmatpush3.msra.mxu0 %v719_v43  ;;  %2462 = vmatpush3.msra.mxu1 %v2212_v45 }
 0x15c   :  { %v2587_v23 = vunpack.i.l.bf16 %v2586_v19  ;;  %v325_v26 = vsel %vm308_vm7, %v250_v22, %v3104_v21  ;;  %v2588_v32 = vunpack.i.h.bf16 %v2586_v19  ;;  %2477 = vmatprep.subr.mxu0 %v718_v44  ;;  %2463 = vmatprep.subr.mxu1 %v2211_v46  ;;  %v2172_v19 = vld [vmem:[%s3885_s7] ss:$0 sm:$0xff] }
 0x15d   :  { %439 = vmatmul.mubr.f32.gmra.mxu1 %v320_v24  ;;  %555 = vmatmul.mubr.f32.gmra.mxu0 %v320_v24 }
 0x15e   :  { %2175 = vmatprep.mubr.msk.f32.mxu1 %vm356_vm9, %v325_v26  ;;  %2203 = vmatprep.mubr.msk.f32.mxu0 %vm356_vm9, %v325_v26  ;;  %v316_v31 = vsel %vm313_vm11, %v311_v28, %v2587_v23  ;;  %v317_v41 = vsel %vm313_vm11, %v312_v39, %v2588_v32 }
 0x15f   :  { %v285_v33 = vpop.permute.xlu0 %284  ;;  %v3117_v34 = vpop.permute.xlu1 %302  ;;  %2478 = vmatpush3.msra.mxu0 %v718_v44  ;;  %2464 = vmatpush3.msra.mxu1 %v2211_v46 }
 0x160   :  { %v321_v36 = vsel %vm318_vm12, %v316_v31, %v285_v33  ;;  %v326_v37 = vsel %vm308_vm7, %v251_v35, %v3117_v34  ;;  %2479 = vmatprep.subr.mxu0 %v717_v47  ;;  %2465 = vmatprep.subr.mxu1 %v2210_v49 }
 0x161   :  { %444 = vmatmul.mubr.f32.gmra.mxu1 %v321_v36  ;;  %560 = vmatmul.mubr.f32.gmra.mxu0 %v321_v36 }
 0x162   :  { %2176 = vmatprep.mubr.msk.f32.mxu1 %vm356_vm9, %v326_v37  ;;  %2204 = vmatprep.mubr.msk.f32.mxu0 %vm356_vm9, %v326_v37 }
 0x163   :  { %v287_v40 = vpop.permute.xlu0 %286  ;;  %2480 = vmatpush3.msra.mxu0 %v717_v47  ;;  %2466 = vmatpush3.msra.mxu1 %v2210_v49 }
 0x164   :  { %v322_v42 = vsel %vm318_vm12, %v317_v41, %v287_v40  ;;  %2481 = vmatprep.subr.mxu0 %v716_v51  ;;  %2467 = vmatprep.subr.mxu1 %v2209_v52 }
 0x165   :  { %449 = vmatmul.mubr.f32.gmra.mxu1 %v322_v42  ;;  %565 = vmatmul.mubr.f32.gmra.mxu0 %v322_v42 }
 0x166   :  { %2482 = vmatpush3.msra.mxu0 %v716_v51  ;;  %2468 = vmatpush3.msra.mxu1 %v2209_v52 }
 0x167   :  { %1069 = vmatprep.subr.mxu0 %v2720_v9  ;;  %953 = vmatprep.subr.mxu1 %v2720_v9 }
 0x219   :  { %v435_v55 = vpop.f32.mrf.mxu1  ;;  %v551_v56 = vpop.f32.mrf.mxu0 }
 0x21a   :  { %v552_v57 = vadd.f32 %v2200_v53, %v551_v56  ;;  %v436_v27 = vadd.f32 %v2172_v19, %v435_v55  ;;  %v2239_v55 = vld [vmem:[%s3884_s6 + $0x1d8] sm:$0xff]  ;;  %v2267_v56 = vld [vmem:[%s3884_s6 + $0x288] sm:$0xff] }
 0x21b   :  { %v437_v59 = vpop.f32.mrf.mxu1  ;;  %v553_v60 = vpop.f32.mrf.mxu0 }
 0x21c   :  { %v2205_v61 = vmul.f32 -1.442695, %v552_v57  ;;  %v2238_v57 = vld [vmem:[%s3884_s6 + $0x1d0] sm:$0xff]  ;;  %v2266_v59 = vld [vmem:[%s3884_s6 + $0x280] sm:$0xff]  ;;  %v2237_v60 = vld [vmem:[%s3884_s6 + $0x1c8] sm:$0xff] }
 0x21d   :  { %v440_v62 = vpop.f32.mrf.mxu1  ;;  %v556_v63 = vpop.f32.mrf.mxu0 }
 0x21e   :  { %2624 = vpow2.f32 %v2205_v61  ;;  %v557_v0 = vadd.f32 %v2200_v53, %v556_v63  ;;  %v441_v30 = vadd.f32 %v2172_v19, %v440_v62  ;;  %v2265_v61 = vld [vmem:[%s3884_s6 + $0x278] sm:$0xff]  ;;  %v2236_v62 = vld [vmem:[%s3884_s6 + $0x1c0] sm:$0xff]  ;;  %v2264_v63 = vld [vmem:[%s3884_s6 + $0x270] sm:$0xff] }
 0x21f   :  { %v442_v2 = vpop.f32.mrf.mxu1  ;;  %v558_v5 = vpop.f32.mrf.mxu0 }
 0x220   :  { %v2206_v6 = vmul.f32 -1.442695, %v557_v0  ;;  %v2235_v0 = vld [vmem:[%s3884_s6 + $0x1b8] sm:$0xff]  ;;  %v2263_v2 = vld [vmem:[%s3884_s6 + $0x268] sm:$0xff]  ;;  %v2234_v5 = vld [vmem:[%s3884_s6 + $0x1b0] sm:$0xff] }
 0x221   :  { %v445_v7 = vpop.f32.mrf.mxu1  ;;  %v561_v10 = vpop.f32.mrf.mxu0 }
 0x222   :  { %2626 = vpow2.f32 %v2206_v6  ;;  %v562_v12 = vadd.f32 %v2200_v53, %v561_v10  ;;  %v446_v33 = vadd.f32 %v2172_v19, %v445_v7  ;;  %v2262_v6 = vld [vmem:[%s3884_s6 + $0x260] sm:$0xff]  ;;  %v2233_v7 = vld [vmem:[%s3884_s6 + $0x1a8] sm:$0xff]  ;;  %v2261_v10 = vld [vmem:[%s3884_s6 + $0x258] sm:$0xff] }
 0x223   :  { %v447_v13 = vpop.f32.mrf.mxu1  ;;  %v563_v14 = vpop.f32.mrf.mxu0 }
 0x224   :  { %v2207_v15 = vmul.f32 -1.442695, %v562_v12  ;;  %v2232_v12 = vld [vmem:[%s3884_s6 + $0x1a0] sm:$0xff]  ;;  %v2260_v13 = vld [vmem:[%s3884_s6 + $0x250] sm:$0xff]  ;;  %v2231_v14 = vld [vmem:[%s3884_s6 + $0x198] sm:$0xff] }
 0x225   :  { %v450_v16 = vpop.f32.mrf.mxu1  ;;  %v566_v17 = vpop.f32.mrf.mxu0 }
 0x226   :  { %2628 = vpow2.f32 %v2207_v15  ;;  %v567_v22 = vadd.f32 %v2200_v53, %v566_v17  ;;  %v451_v37 = vadd.f32 %v2172_v19, %v450_v16  ;;  %v2259_v15 = vld [vmem:[%s3884_s6 + $0x248] sm:$0xff]  ;;  %v2230_v16 = vld [vmem:[%s3884_s6 + $0x190] sm:$0xff]  ;;  %v2258_v17 = vld [vmem:[%s3884_s6 + $0x240] sm:$0xff] }
 0x227   :  { %v452_v23 = vpop.f32.mrf.mxu1  ;;  %v568_v24 = vpop.f32.mrf.mxu0  ;;  %v2229_v19 = vld [vmem:[%s3884_s6 + $0x188] sm:$0xff] }
 0x228   :  { %v2208_v26 = vmul.f32 -1.442695, %v567_v22  ;;  %v2257_v22 = vld [vmem:[%s3884_s6 + $0x238] sm:$0xff]  ;;  %v2228_v23 = vld [vmem:[%s3884_s6 + $0x180] sm:$0xff]  ;;  %v2256_v24 = vld [vmem:[%s3884_s6 + $0x230] sm:$0xff] }
 0x22a   :  { %2630 = vpow2.f32 %v2208_v26  ;;  %v2227_v26 = vld [vmem:[%s3884_s6 + $0x178] sm:$0xff] }
 0x22b   :  { %v2625_v28 = vpop.eup %2624  ;;  %2632 = vtanh.f32 %v436_v27  ;;  %v2255_v27 = vld [vmem:[%s3884_s6 + $0x228] sm:$0xff] }
 0x22c   :  { %v586_v29 = vadd.f32 1.0, %v2625_v28  ;;  %v2226_v28 = vld [vmem:[%s3884_s6 + $0x170] sm:$0xff] }
 0x22e   :  { %2634 = vrcp.f32 %v586_v29  ;;  %v2254_v29 = vld [vmem:[%s3884_s6 + $0x220] sm:$0xff] }
 0x22f   :  { %v2627_v31 = vpop.eup %2626  ;;  %2636 = vtanh.f32 %v441_v30  ;;  %v2225_v30 = vld [vmem:[%s3884_s6 + $0x168] sm:$0xff] }
 0x230   :  { %v587_v32 = vadd.f32 1.0, %v2627_v31  ;;  %v2253_v31 = vld [vmem:[%s3884_s6 + $0x218] sm:$0xff] }
 0x232   :  { %2638 = vrcp.f32 %v587_v32  ;;  %v2224_v32 = vld [vmem:[%s3884_s6 + $0x160] sm:$0xff] }
 0x233   :  { %v2629_v35 = vpop.eup %2628  ;;  %2640 = vtanh.f32 %v446_v33  ;;  %v2252_v33 = vld [vmem:[%s3884_s6 + $0x210] sm:$0xff] }
 0x234   :  { %v588_v36 = vadd.f32 1.0, %v2629_v35  ;;  %v2273_v35 = vld [vmem:[%s3884_s6 + $0x2b8] sm:$0xff] }
 0x236   :  { %2642 = vrcp.f32 %v588_v36  ;;  %v2219_v36 = vld [vmem:[%s3887_s9] ss:$0 sm:$0xff] }
 0x237   :  { %v2631_v38 = vpop.eup %2630  ;;  %2644 = vtanh.f32 %v451_v37  ;;  %v2245_v37 = vld [vmem:[%s3884_s6 + $0x208] sm:$0xff] }
 0x238   :  { %v589_v39 = vadd.f32 1.0, %v2631_v38  ;;  %v2633_v40 = vpop.eup %2632  ;;  %v2244_v38 = vld [vmem:[%s3884_s6 + $0x200] sm:$0xff] }
 0x23a   :  { %2646 = vrcp.f32 %v589_v39  ;;  %v2272_v39 = vld [vmem:[%s3884_s6 + $0x2b0] sm:$0xff] }
 0x23b   :  { %v2635_v41 = vpop.eup %2634 }
 0x23c   :  { %v598_v42 = vmul.f32 %v2635_v41, %v2633_v40  ;;  %v2637_v43 = vpop.eup %2636 }
 0x23e   :  { %2469 = vmatprep.mubr.msk.f32.mxu1 %vm308_vm7, %v598_v42  ;;  %2483 = vmatprep.mubr.msk.f32.mxu0 %vm308_vm7, %v598_v42 }
 0x23f   :  { %v2639_v44 = vpop.eup %2638 }
 0x240   :  { %v599_v45 = vmul.f32 %v2639_v44, %v2637_v43  ;;  %v2641_v46 = vpop.eup %2640 }
 0x242   :  { %2470 = vmatmul.mubr.msk.f32.vlgmr.msra.gmra.mxu1 %vm308_vm7, %v599_v45  ;;  %2484 = vmatmul.mubr.msk.f32.vlgmr.msra.gmra.mxu0 %vm308_vm7, %v599_v45  ;;  %v2243_v45 = vld [vmem:[%s3884_s6 + $0x1f8] sm:$0xff] }
 0x243   :  { %v2643_v47 = vpop.eup %2642  ;;  %954 = vmatpush1.msra.mxu1 %v2239_v55  ;;  %1070 = vmatpush1.msra.mxu0 %v2267_v56 }
 0x244   :  { %v600_v49 = vmul.f32 %v2643_v47, %v2641_v46  ;;  %v2645_v51 = vpop.eup %2644  ;;  %955 = vmatprep.subr.mxu1 %v2720_v9  ;;  %1071 = vmatprep.subr.mxu0 %v2720_v9  ;;  %v2271_v46 = vld [vmem:[%s3884_s6 + $0x2a8] sm:$0xff]  ;;  %v2242_v47 = vld [vmem:[%s3884_s6 + $0x1f0] sm:$0xff] }
 0x245   :  { %956 = vmatpush1.msra.mxu1 %v2238_v57  ;;  %1072 = vmatpush1.msra.mxu0 %v2266_v59 }
 0x246   :  { %2472 = vmatprep.mubr.msk.f32.mxu1 %vm308_vm7, %v600_v49  ;;  %2486 = vmatprep.mubr.msk.f32.mxu0 %vm308_vm7, %v600_v49 }
 0x247   :  { %v2647_v52 = vpop.eup %2646  ;;  %957 = vmatprep.subr.mxu1 %v2720_v9  ;;  %1073 = vmatprep.subr.mxu0 %v2720_v9 }
 0x248   :  { %v601_v53 = vmul.f32 %v2647_v52, %v2645_v51  ;;  %958 = vmatpush1.msra.mxu1 %v2237_v60  ;;  %1074 = vmatpush1.msra.mxu0 %v2265_v61  ;;  %v2241_v52 = vld [vmem:[%s3884_s6 + $0x1e8] sm:$0xff]  ;;  %v2240_v61 = vld [vmem:[%s3884_s6 + $0x1e0] sm:$0xff] }
 0x249   :  { %959 = vmatprep.subr.mxu1 %v2720_v9  ;;  %1075 = vmatprep.subr.mxu0 %v2720_v9 }
 0x24a   :  { %2473 = vmatmul.mubr.msk.f32.gmra.mxu1 %vm308_vm7, %v601_v53  ;;  %2487 = vmatmul.mubr.msk.f32.gmra.mxu0 %vm308_vm7, %v601_v53  ;;  %v2269_v53 = vld [vmem:[%s3884_s6 + $0x298] sm:$0xff] }
 0x24b   :  { %960 = vmatpush1.msra.mxu1 %v2236_v62  ;;  %1076 = vmatpush1.msra.mxu0 %v2264_v63 }
 0x24c   :  { %961 = vmatprep.subr.mxu1 %v2720_v9  ;;  %1077 = vmatprep.subr.mxu0 %v2720_v9 }
 0x24d   :  { %962 = vmatpush1.msra.mxu1 %v2235_v0  ;;  %1078 = vmatpush1.msra.mxu0 %v2263_v2 }
 0x24e   :  { %963 = vmatprep.subr.mxu1 %v2720_v9  ;;  %1079 = vmatprep.subr.mxu0 %v2720_v9 }
 0x24f   :  { %964 = vmatpush1.msra.mxu1 %v2234_v5  ;;  %1080 = vmatpush1.msra.mxu0 %v2262_v6 }
 0x250   :  { %965 = vmatprep.subr.mxu1 %v2720_v9  ;;  %1081 = vmatprep.subr.mxu0 %v2720_v9 }
 0x251   :  { %966 = vmatpush1.msra.mxu1 %v2233_v7  ;;  %1082 = vmatpush1.msra.mxu0 %v2261_v10  ;;  %v2268_v7 = vld [vmem:[%s3884_s6 + $0x290] sm:$0xff] }
 0x252   :  { %967 = vmatprep.subr.mxu1 %v2720_v9  ;;  %1083 = vmatprep.subr.mxu0 %v2720_v9 }
 0x253   :  { %968 = vmatpush1.msra.mxu1 %v2232_v12  ;;  %1084 = vmatpush1.msra.mxu0 %v2260_v13 }
 0x254   :  { %969 = vmatprep.subr.mxu1 %v2720_v9  ;;  %1085 = vmatprep.subr.mxu0 %v2720_v9 }
 0x255   :  { %970 = vmatpush1.msra.mxu1 %v2231_v14  ;;  %1086 = vmatpush1.msra.mxu0 %v2259_v15 }
 0x256   :  { %971 = vmatprep.subr.mxu1 %v2720_v9  ;;  %1087 = vmatprep.subr.mxu0 %v2720_v9 }
 0x257   :  { %972 = vmatpush1.msra.mxu1 %v2230_v16  ;;  %1088 = vmatpush1.msra.mxu0 %v2258_v17 }
 0x258   :  { %973 = vmatprep.subr.mxu1 %v2720_v9  ;;  %1089 = vmatprep.subr.mxu0 %v2720_v9 }
 0x259   :  { %974 = vmatpush1.msra.mxu1 %v2229_v19  ;;  %1090 = vmatpush1.msra.mxu0 %v2257_v22 }
 0x25a   :  { %975 = vmatprep.subr.mxu1 %v2720_v9  ;;  %1091 = vmatprep.subr.mxu0 %v2720_v9 }
 0x25b   :  { %976 = vmatpush1.msra.mxu1 %v2228_v23  ;;  %1092 = vmatpush1.msra.mxu0 %v2256_v24 }
 0x25c   :  { %977 = vmatprep.subr.mxu1 %v2720_v9  ;;  %1093 = vmatprep.subr.mxu0 %v2720_v9 }
 0x25d   :  { %978 = vmatpush1.msra.mxu1 %v2227_v26  ;;  %1094 = vmatpush1.msra.mxu0 %v2255_v27 }
 0x25e   :  { %979 = vmatprep.subr.mxu1 %v2720_v9  ;;  %1095 = vmatprep.subr.mxu0 %v2720_v9 }
 0x25f   :  { %980 = vmatpush1.msra.mxu1 %v2226_v28  ;;  %1096 = vmatpush1.msra.mxu0 %v2254_v29 }
 0x260   :  { %981 = vmatprep.subr.mxu1 %v2720_v9  ;;  %1097 = vmatprep.subr.mxu0 %v2720_v9 }
 0x261   :  { %982 = vmatpush1.msra.mxu1 %v2225_v30  ;;  %1098 = vmatpush1.msra.mxu0 %v2253_v31 }
 0x262   :  { %983 = vmatprep.subr.mxu1 %v2720_v9  ;;  %1099 = vmatprep.subr.mxu0 %v2720_v9 }
 0x263   :  { %984 = vmatpush1.msra.mxu1 %v2224_v32  ;;  %1100 = vmatpush1.msra.mxu0 %v2252_v33  ;;  %v3404_v32 = vrot.slane %v2720_v9, 4 }
 0x264   :  { %1005 = vmatprep.subr.mxu1 %v2720_v9  ;;  %1121 = vmatprep.subr.mxu0 %v2720_v9 }
 0x265   :  { %1122 = vmatpush2.msra.mxu0 %v2273_v35  ;;  %1006 = vmatpush2.msra.mxu1 %v2245_v37 }
 0x266   :  { %1123 = vmatprep.subr.mxu0 %v2720_v9  ;;  %1007 = vmatprep.subr.mxu1 %v2720_v9 }
 0x267   :  { %1124 = vmatpush2.msra.mxu0 %v2272_v39  ;;  %1008 = vmatpush2.msra.mxu1 %v2244_v38 }
 0x268   :  { %1125 = vmatprep.subr.mxu0 %v2720_v9  ;;  %1009 = vmatprep.subr.mxu1 %v2720_v9 }
 0x269   :  { %1010 = vmatpush2.msra.mxu1 %v2243_v45  ;;  %1126 = vmatpush2.msra.mxu0 %v2271_v46 }
 0x26a   :  { %1011 = vmatprep.subr.mxu1 %v2720_v9  ;;  %1127 = vmatprep.subr.mxu0 %v2720_v9 }
 0x26b   :  { %1012 = vmatpush2.msra.mxu1 %v2242_v47 }
 0x26c   :  { %1013 = vmatprep.subr.mxu1 %v2720_v9 }
 0x26d   :  { %1014 = vmatpush2.msra.mxu1 %v2241_v52 }
 0x26e   :  { %1015 = vmatprep.subr.mxu1 %v2720_v9 }
 0x26f   :  { %1016 = vmatpush2.msra.mxu1 %v2240_v61 }
 0x302   :  { %v2485_v40 = vpop.f32.mrf.mxu0 }
 0x303   :  { %v799_v41 = vadd.f32 %v2485_v40, %v2219_v36 }
 0x304   :  { %v793_v42 = vpop.f32.mrf.mxu0 }
 0x305   :  { %v813_v43 = vadd.f32 %v799_v41, %v3002_v3  ;;  %v794_v44 = vadd.f32 %v2219_v36, %v793_v42  ;;  %v2270_v3 = vld [vmem:[%s3884_s6 + $0x2a0] sm:$0xff] }
 0x306   :  { %1128 = vmatpush2.msra.mxu0 %v2270_v3 }
 0x307   :  { %v3328_v49 = vmul.f32 %v813_v43, %v2999_v1  ;;  %v812_v51 = vadd.f32 %v794_v44, %v3016_v11  ;;  %1129 = vmatprep.subr.mxu0 %v2720_v9 }
 0x308   :  { %1130 = vmatpush2.msra.mxu0 %v2269_v53 }
 0x309   :  { %v3343_v11 = vmul.f32 %v812_v51, %v2970_v54  ;;  %v828_v60 = vrot.slane %v3328_v49, 4  ;;  %v840_v0 = vrot.slane %v3328_v49, 6  ;;  %1131 = vmatprep.subr.mxu0 %v2720_v9  ;;  %v847_v14 = vrot.slane %v3328_v49, 2 }
 0x30a   :  { %v2488_v55 = vpop.f32.mrf.mxu0  ;;  %1132 = vmatpush2.msra.mxu0 %v2268_v7 }
 0x30b   :  { %v809_v56 = vadd.f32 %v2488_v55, %v2219_v36  ;;  %v2594_v57 = vpack.i.bf16 %v3328_v49, %v3343_v11  ;;  %v826_v59 = vrot.slane %v3343_v11, 4  ;;  %v838_v63 = vrot.slane %v3343_v11, 6 }
 0x30c   :  { %v803_v62 = vpop.f32.mrf.mxu0  ;;  %v846_v2 = vrot.slane %v3343_v11, 2  ;;  %v849_v23 = vsel %vm242_vm5, %v847_v14, %v3080_v50  ;;  %v854_v44 = vsel %vm824_vm13, %v828_v60, %v3404_v32 }
 0x30d   :  { %v804_v5 = vadd.f32 %v2219_v36, %v803_v62  ;;  %2595 = vrot.lane.b32.xlu0 %v2594_v57, %s2722_s30  ;;  %v829_v6 = vsel %vm824_vm13, %v826_v59, %v828_v60  ;;  %v839_v12 = vsel %vm208_vm10, %v3076_v48, %v838_v63  ;;  %v841_v13 = vsel %vm208_vm10, %v838_v63, %v840_v0 }
 0x30e   :  { %v906_v10 = vsel %vm308_vm7, %v829_v6, %v3026_v20  ;;  %v815_v15 = vadd.f32 %v809_v56, %v3022_v18  ;;  %v2599_v17 = vpack.i.bf16 %v841_v13, %v839_v12  ;;  %v848_v19 = vsel %vm242_vm5, %v846_v2, %v847_v14 }
 0x30f   :  { %v814_v16 = vadd.f32 %v804_v5, %v3033_v25  ;;  %2248 = vmatprep.mubr.msk.f32.mxu1 %vm356_vm9, %v906_v10  ;;  %2276 = vmatprep.mubr.msk.f32.mxu0 %vm356_vm9, %v906_v10  ;;  %v2604_v25 = vpack.i.bf16 %v849_v23, %v848_v19  ;;  %v827_v37 = vsel %vm824_vm13, %v3404_v32, %v826_v59  ;;  %v2287_v19 = vld [vmem:[%s3886_s8 + $0x78] sm:$0xff]  ;;  %v2286_v23 = vld [vmem:[%s3886_s8 + $0x70] sm:$0xff] }
 0x310   :  { %2600 = vrot.lane.b32.xlu1 %v2599_v17, %s2721_s21  ;;  %v3382_v18 = vmul.f32 %v815_v15, %v3012_v8  ;;  %v907_v56 = vsel %vm308_vm7, %v854_v44, %v3092_v4  ;;  %v2296_v17 = vld [vmem:[%s3886_s8 + $0x50] sm:$0xff]  ;;  %2489 = vmatprep.subr.mxu1 %v2287_v19 }
 0x311   :  { %v3376_v22 = vmul.f32 %v814_v16, %v2981_v58  ;;  %v2297_v16 = vld [vmem:[%s3886_s8 + $0x58] sm:$0xff] }
 0x312   :  { %v851_v28 = vrot.slane %v3382_v18, 2  ;;  %v844_v30 = vrot.slane %v3382_v18, 6  ;;  %v832_v51 = vrot.slane %v3382_v18, 4  ;;  %2503 = vmatprep.subr.mxu0 %v2297_v16 }
 0x313   :  { %v842_v24 = vrot.slane %v3376_v22, 6  ;;  %v850_v27 = vrot.slane %v3376_v22, 2  ;;  %v830_v42 = vrot.slane %v3376_v22, 4 }
 0x314   :  { %2605 = vrot.lane.b32.xlu1 %v2604_v25, %s2723_s13  ;;  %v855_v7 = vsel %vm824_vm13, %v832_v51, %v3404_v32  ;;  %v2295_v25 = vld [vmem:[%s3886_s8 + $0x48] sm:$0xff] }
 0x315   :  { %v843_v26 = vsel %vm208_vm10, %v3076_v48, %v842_v24  ;;  %v852_v29 = vsel %vm242_vm5, %v850_v27, %v851_v28  ;;  %v845_v31 = vsel %vm208_vm10, %v842_v24, %v844_v30  ;;  %v853_v48 = vsel %vm242_vm5, %v851_v28, %v3080_v50  ;;  %v2285_v24 = vld [vmem:[%s3886_s8 + $0x68] sm:$0xff]  ;;  %v2284_v27 = vld [vmem:[%s3886_s8 + $0x60] sm:$0xff]  ;;  %v3467_v28 = vpop.f32.mrf.mxu1 }
 0x316   :  { %862 = vrot.lane.b32.xlu0 %v843_v26, %s2721_s21  ;;  %v831_v53 = vsel %vm824_vm13, %v3404_v32, %v830_v42  ;;  %v833_v60 = vsel %vm824_vm13, %v830_v42, %v832_v51  ;;  %v909_v14 = vsel %vm308_vm7, %v855_v7, %v3117_v34  ;;  %v2294_v26 = vld [vmem:[%s3886_s8 + $0x40] sm:$0xff] }
 0x317   :  { %v908_v2 = vsel %vm308_vm7, %v833_v60, %v3104_v21 }
 0x318   :  { %874 = vrot.lane.b32.xlu1 %v3376_v22, %s2722_s30 }
 0x31a   :  { %886 = vrot.lane.b32.xlu0 %v852_v29, %s2723_s13  ;;  %v3469_v29 = vpop.f32.mrf.mxu1 }
 0x31c   :  { %864 = vrot.lane.b32.xlu1 %v845_v31, %s2721_s21  ;;  %v3471_v30 = vpop.f32.mrf.mxu1 }
 0x31e   :  { %876 = vrot.lane.b32.xlu0 %v3382_v18, %s2722_s30  ;;  %v3473_v31 = vpop.f32.mrf.mxu1 }
 0x320   :  { %888 = vrot.lane.b32.xlu1 %v853_v48, %s2723_s13  ;;  %v2275_v48 = vld [vmem:[%s3885_s7 + $0x3] ss:$0 sm:$0xff] }
 0x37f   :  { %v2596_v35 = vpop.permute.xlu0 %2595 }
 0x380   :  { %v2597_v40 = vunpack.i.l.bf16 %v2596_v35  ;;  %v2598_v52 = vunpack.i.h.bf16 %v2596_v35 }
 0x382   :  { %v2601_v33 = vpop.permute.xlu1 %2600 }
 0x383   :  { %v2602_v36 = vunpack.i.l.bf16 %v2601_v33  ;;  %v2603_v38 = vunpack.i.h.bf16 %v2601_v33 }
 0x385   :  { %v894_v39 = vsel %vm308_vm7, %v827_v37, %v2602_v36  ;;  %v895_v3 = vsel %vm308_vm7, %v829_v6, %v2603_v38 }
 0x386   :  { %v2606_v41 = vpop.permute.xlu1 %2605  ;;  %v898_v45 = vsel %vm313_vm11, %v894_v39, %v2597_v40  ;;  %v899_v61 = vsel %vm313_vm11, %v895_v3, %v2598_v52 }
 0x387   :  { %v2607_v43 = vunpack.i.l.bf16 %v2606_v41  ;;  %v2608_v46 = vunpack.i.h.bf16 %v2606_v41 }
 0x388   :  { %v863_v50 = vpop.permute.xlu0 %862 }
 0x389   :  { %v902_v47 = vsel %vm318_vm12, %v898_v45, %v2607_v43  ;;  %v896_v57 = vsel %vm308_vm7, %v831_v53, %v863_v50  ;;  %v903_v62 = vsel %vm318_vm12, %v899_v61, %v2608_v46 }
 0x38a   :  { %v875_v55 = vpop.permute.xlu1 %874  ;;  %1018 = vmatmul.mubr.f32.vlgmr.msra.gmra.mxu1 %v902_v47  ;;  %1134 = vmatmul.mubr.f32.vlgmr.msra.gmra.mxu0 %v902_v47 }
 0x38b   :  { %2249 = vmatprep.mubr.msk.f32.mxu1 %vm356_vm9, %v907_v56  ;;  %2277 = vmatprep.mubr.msk.f32.mxu0 %vm356_vm9, %v907_v56  ;;  %v900_v63 = vsel %vm313_vm11, %v896_v57, %v875_v55  ;;  %v2247_v56 = vld [vmem:[%s3885_s7 + $0x2] ss:$0 sm:$0xff] }
 0x38c   :  { %v887_v59 = vpop.permute.xlu0 %886  ;;  %2504 = vmatpush3.msra.mxu0 %v2297_v16  ;;  %2490 = vmatpush3.msra.mxu1 %v2287_v19 }
 0x38d   :  { %v904_v10 = vsel %vm318_vm12, %v900_v63, %v887_v59  ;;  %2505 = vmatprep.subr.mxu0 %v2296_v17  ;;  %2491 = vmatprep.subr.mxu1 %v2286_v23 }
 0x38e   :  { %v865_v0 = vpop.permute.xlu1 %864  ;;  %1023 = vmatmul.mubr.f32.gmra.mxu1 %v903_v62  ;;  %1139 = vmatmul.mubr.f32.gmra.mxu0 %v903_v62 }
 0x38f   :  { %v897_v5 = vsel %vm308_vm7, %v833_v60, %v865_v0  ;;  %2250 = vmatprep.mubr.msk.f32.mxu1 %vm356_vm9, %v908_v2  ;;  %2278 = vmatprep.mubr.msk.f32.mxu0 %vm356_vm9, %v908_v2 }
 0x390   :  { %v877_v6 = vpop.permute.xlu0 %876  ;;  %2506 = vmatpush3.msra.mxu0 %v2296_v17  ;;  %2492 = vmatpush3.msra.mxu1 %v2286_v23 }
 0x391   :  { %v901_v12 = vsel %vm313_vm11, %v897_v5, %v877_v6  ;;  %2507 = vmatprep.subr.mxu0 %v2295_v25  ;;  %2493 = vmatprep.subr.mxu1 %v2285_v24 }
 0x392   :  { %v889_v13 = vpop.permute.xlu1 %888  ;;  %1028 = vmatmul.mubr.f32.gmra.mxu1 %v904_v10  ;;  %1144 = vmatmul.mubr.f32.gmra.mxu0 %v904_v10 }
 0x393   :  { %2251 = vmatprep.mubr.msk.f32.mxu1 %vm356_vm9, %v909_v14  ;;  %2279 = vmatprep.mubr.msk.f32.mxu0 %vm356_vm9, %v909_v14  ;;  %v905_v15 = vsel %vm318_vm12, %v901_v12, %v889_v13 }
 0x394   :  { %2508 = vmatpush3.msra.mxu0 %v2295_v25  ;;  %2494 = vmatpush3.msra.mxu1 %v2285_v24 }
 0x395   :  { %2509 = vmatprep.subr.mxu0 %v2294_v26  ;;  %2495 = vmatprep.subr.mxu1 %v2284_v27 }
 0x396   :  { %1033 = vmatmul.mubr.f32.gmra.mxu1 %v905_v15  ;;  %1149 = vmatmul.mubr.f32.gmra.mxu0 %v905_v15 }
 0x397   :  { %2510 = vmatpush3.msra.mxu0 %v2294_v26  ;;  %2496 = vmatpush3.msra.mxu1 %v2284_v27 }
 0x398   :  { %1631 = vmatprep.subr.mxu0 %v2720_v9  ;;  %1515 = vmatprep.subr.mxu1 %v2720_v9 }
 0x44a   :  { %v1019_v33 = vpop.f32.mrf.mxu1  ;;  %v1135_v35 = vpop.f32.mrf.mxu0 }
 0x44b   :  { %v1136_v36 = vadd.f32 %v2275_v48, %v1135_v35  ;;  %v1020_v62 = vadd.f32 %v2247_v56, %v1019_v33 }
 0x44c   :  { %v1021_v37 = vpop.f32.mrf.mxu1  ;;  %v1137_v38 = vpop.f32.mrf.mxu0 }
 0x44d   :  { %v2280_v39 = vmul.f32 -1.442695, %v1136_v36  ;;  %v2319_v37 = vld [vmem:[%s3884_s6 + $0x338] sm:$0xff]  ;;  %v2347_v38 = vld [vmem:[%s3884_s6 + $0x3e8] sm:$0xff] }
 0x44e   :  { %v1024_v40 = vpop.f32.mrf.mxu1  ;;  %v1140_v41 = vpop.f32.mrf.mxu0 }
 0x44f   :  { %2648 = vpow2.f32 %v2280_v39  ;;  %v1141_v42 = vadd.f32 %v2275_v48, %v1140_v41  ;;  %v1025_v2 = vadd.f32 %v2247_v56, %v1024_v40  ;;  %v2318_v39 = vld [vmem:[%s3884_s6 + $0x330] sm:$0xff]  ;;  %v2346_v40 = vld [vmem:[%s3884_s6 + $0x3e0] sm:$0xff]  ;;  %v2317_v41 = vld [vmem:[%s3884_s6 + $0x328] sm:$0xff] }
 0x450   :  { %v1026_v43 = vpop.f32.mrf.mxu1  ;;  %v1142_v50 = vpop.f32.mrf.mxu0 }
 0x451   :  { %v2281_v44 = vmul.f32 -1.442695, %v1141_v42  ;;  %v2345_v42 = vld [vmem:[%s3884_s6 + $0x3d8] sm:$0xff]  ;;  %v2316_v43 = vld [vmem:[%s3884_s6 + $0x320] sm:$0xff]  ;;  %v2344_v50 = vld [vmem:[%s3884_s6 + $0x3d0] sm:$0xff] }
 0x452   :  { %v1029_v45 = vpop.f32.mrf.mxu1  ;;  %v1145_v46 = vpop.f32.mrf.mxu0 }
 0x453   :  { %2650 = vpow2.f32 %v2281_v44  ;;  %v1146_v47 = vadd.f32 %v2275_v48, %v1145_v46  ;;  %v1030_v7 = vadd.f32 %v2247_v56, %v1029_v45  ;;  %v2315_v44 = vld [vmem:[%s3884_s6 + $0x318] sm:$0xff]  ;;  %v2343_v45 = vld [vmem:[%s3884_s6 + $0x3c8] sm:$0xff]  ;;  %v2314_v46 = vld [vmem:[%s3884_s6 + $0x310] sm:$0xff] }
 0x454   :  { %v1031_v51 = vpop.f32.mrf.mxu1  ;;  %v1147_v3 = vpop.f32.mrf.mxu0 }
 0x455   :  { %v2282_v52 = vmul.f32 -1.442695, %v1146_v47  ;;  %v2342_v47 = vld [vmem:[%s3884_s6 + $0x3c0] sm:$0xff]  ;;  %v2313_v51 = vld [vmem:[%s3884_s6 + $0x308] sm:$0xff]  ;;  %v2341_v3 = vld [vmem:[%s3884_s6 + $0x3b8] sm:$0xff] }
 0x456   :  { %v1034_v53 = vpop.f32.mrf.mxu1  ;;  %v1150_v55 = vpop.f32.mrf.mxu0 }
 0x457   :  { %2652 = vpow2.f32 %v2282_v52  ;;  %v1151_v57 = vadd.f32 %v2275_v48, %v1150_v55  ;;  %v1035_v13 = vadd.f32 %v2247_v56, %v1034_v53  ;;  %v2312_v52 = vld [vmem:[%s3884_s6 + $0x300] sm:$0xff]  ;;  %v2340_v53 = vld [vmem:[%s3884_s6 + $0x3b0] sm:$0xff]  ;;  %v2311_v55 = vld [vmem:[%s3884_s6 + $0x2f8] sm:$0xff] }
 0x458   :  { %v1036_v59 = vpop.f32.mrf.mxu1  ;;  %v1152_v60 = vpop.f32.mrf.mxu0  ;;  %v2339_v56 = vld [vmem:[%s3884_s6 + $0x3a8] sm:$0xff] }
 0x459   :  { %v2283_v61 = vmul.f32 -1.442695, %v1151_v57  ;;  %v2310_v57 = vld [vmem:[%s3884_s6 + $0x2f0] sm:$0xff]  ;;  %v2338_v59 = vld [vmem:[%s3884_s6 + $0x3a0] sm:$0xff]  ;;  %v2309_v60 = vld [vmem:[%s3884_s6 + $0x2e8] sm:$0xff] }
 0x45b   :  { %2654 = vpow2.f32 %v2283_v61  ;;  %v2337_v61 = vld [vmem:[%s3884_s6 + $0x398] sm:$0xff] }
 0x45c   :  { %v2649_v63 = vpop.eup %2648  ;;  %2656 = vtanh.f32 %v1020_v62  ;;  %v2308_v62 = vld [vmem:[%s3884_s6 + $0x2e0] sm:$0xff] }
 0x45d   :  { %v1170_v0 = vadd.f32 1.0, %v2649_v63  ;;  %v2336_v63 = vld [vmem:[%s3884_s6 + $0x390] sm:$0xff] }
 0x45f   :  { %2658 = vrcp.f32 %v1170_v0  ;;  %v2307_v0 = vld [vmem:[%s3884_s6 + $0x2d8] sm:$0xff] }
 0x460   :  { %v2651_v5 = vpop.eup %2650  ;;  %2660 = vtanh.f32 %v1025_v2  ;;  %v2335_v2 = vld [vmem:[%s3884_s6 + $0x388] sm:$0xff] }
 0x461   :  { %v1171_v6 = vadd.f32 1.0, %v2651_v5  ;;  %v2306_v5 = vld [vmem:[%s3884_s6 + $0x2d0] sm:$0xff] }
 0x463   :  { %2662 = vrcp.f32 %v1171_v6  ;;  %v2334_v6 = vld [vmem:[%s3884_s6 + $0x380] sm:$0xff] }
 0x464   :  { %v2653_v10 = vpop.eup %2652  ;;  %2664 = vtanh.f32 %v1030_v7  ;;  %v2305_v7 = vld [vmem:[%s3884_s6 + $0x2c8] sm:$0xff] }
 0x465   :  { %v1172_v12 = vadd.f32 1.0, %v2653_v10  ;;  %v2333_v10 = vld [vmem:[%s3884_s6 + $0x378] sm:$0xff] }
 0x467   :  { %2666 = vrcp.f32 %v1172_v12  ;;  %v2304_v12 = vld [vmem:[%s3884_s6 + $0x2c0] sm:$0xff] }
 0x468   :  { %v2655_v14 = vpop.eup %2654  ;;  %2668 = vtanh.f32 %v1035_v13  ;;  %v2332_v13 = vld [vmem:[%s3884_s6 + $0x370] sm:$0xff] }
 0x469   :  { %v1173_v15 = vadd.f32 1.0, %v2655_v14  ;;  %v2657_v16 = vpop.eup %2656  ;;  %v2353_v14 = vld [vmem:[%s3884_s6 + $0x418] sm:$0xff] }
 0x46b   :  { %2670 = vrcp.f32 %v1173_v15  ;;  %v3624_v15 = vld [vmem:[%s3887_s9 + $0x1] ss:$0 sm:$0xff] }
 0x46c   :  { %v2659_v17 = vpop.eup %2658 }
 0x46d   :  { %v1182_v19 = vmul.f32 %v2659_v17, %v2657_v16  ;;  %v2661_v23 = vpop.eup %2660  ;;  %v3629_v16 = vld [vmem:[%s3887_s9 + $0x3] ss:$0 sm:$0xff]  ;;  %v2299_v17 = vld [vmem:[%s3887_s9 + $0x2] ss:$0 sm:$0xff] }
 0x46f   :  { %2497 = vmatprep.mubr.msk.f32.mxu1 %vm308_vm7, %v1182_v19  ;;  %2511 = vmatprep.mubr.msk.f32.mxu0 %vm308_vm7, %v1182_v19  ;;  %v2325_v19 = vld [vmem:[%s3884_s6 + $0x368] sm:$0xff] }
 0x470   :  { %v2663_v25 = vpop.eup %2662 }
 0x471   :  { %v1183_v24 = vmul.f32 %v2663_v25, %v2661_v23  ;;  %v2665_v26 = vpop.eup %2664  ;;  %v2324_v23 = vld [vmem:[%s3884_s6 + $0x360] sm:$0xff]  ;;  %v2352_v25 = vld [vmem:[%s3884_s6 + $0x410] sm:$0xff] }
 0x473   :  { %2498 = vmatmul.mubr.msk.f32.vlgmr.msra.gmra.mxu1 %vm308_vm7, %v1183_v24  ;;  %2512 = vmatmul.mubr.msk.f32.vlgmr.msra.gmra.mxu0 %vm308_vm7, %v1183_v24 }
 0x474   :  { %v2667_v27 = vpop.eup %2666  ;;  %1516 = vmatpush1.msra.mxu1 %v2319_v37  ;;  %1632 = vmatpush1.msra.mxu0 %v2347_v38 }
 0x475   :  { %v1184_v48 = vmul.f32 %v2667_v27, %v2665_v26  ;;  %v2669_v33 = vpop.eup %2668  ;;  %1517 = vmatprep.subr.mxu1 %v2720_v9  ;;  %1633 = vmatprep.subr.mxu0 %v2720_v9  ;;  %v699_v27 = vadd.f32 %v3467_v28, %v3624_v15  ;;  %v2323_v28 = vld [vmem:[%s3884_s6 + $0x358] sm:$0xff] }
 0x476   :  { %1518 = vmatpush1.msra.mxu1 %v2318_v39  ;;  %1634 = vmatpush1.msra.mxu0 %v2346_v40 }
 0x477   :  { %2500 = vmatprep.mubr.msk.f32.mxu1 %vm308_vm7, %v1184_v48  ;;  %2514 = vmatprep.mubr.msk.f32.mxu0 %vm308_vm7, %v1184_v48 }
 0x478   :  { %v2671_v35 = vpop.eup %2670  ;;  %1519 = vmatprep.subr.mxu1 %v2720_v9  ;;  %1635 = vmatprep.subr.mxu0 %v2720_v9 }
 0x479   :  { %v1185_v36 = vmul.f32 %v2671_v35, %v2669_v33  ;;  %1520 = vmatpush1.msra.mxu1 %v2317_v41  ;;  %1636 = vmatpush1.msra.mxu0 %v2345_v42  ;;  %v694_v35 = vadd.f32 %v3624_v15, %v3469_v29  ;;  %v2351_v42 = vld [vmem:[%s3884_s6 + $0x408] sm:$0xff] }
 0x47a   :  { %1521 = vmatprep.subr.mxu1 %v2720_v9  ;;  %1637 = vmatprep.subr.mxu0 %v2720_v9 }
 0x47b   :  { %2501 = vmatmul.mubr.msk.f32.gmra.mxu1 %vm308_vm7, %v1185_v36  ;;  %2515 = vmatmul.mubr.msk.f32.gmra.mxu0 %vm308_vm7, %v1185_v36 }
 0x47c   :  { %1522 = vmatpush1.msra.mxu1 %v2316_v43  ;;  %1638 = vmatpush1.msra.mxu0 %v2344_v50 }
 0x47d   :  { %1523 = vmatprep.subr.mxu1 %v2720_v9  ;;  %1639 = vmatprep.subr.mxu0 %v2720_v9 }
 0x47e   :  { %1524 = vmatpush1.msra.mxu1 %v2315_v44  ;;  %1640 = vmatpush1.msra.mxu0 %v2343_v45  ;;  %v2350_v44 = vld [vmem:[%s3884_s6 + $0x400] sm:$0xff]  ;;  %v2321_v45 = vld [vmem:[%s3884_s6 + $0x348] sm:$0xff] }
 0x47f   :  { %1525 = vmatprep.subr.mxu1 %v2720_v9  ;;  %1641 = vmatprep.subr.mxu0 %v2720_v9 }
 0x480   :  { %1526 = vmatpush1.msra.mxu1 %v2314_v46  ;;  %1642 = vmatpush1.msra.mxu0 %v2342_v47 }
 0x481   :  { %1527 = vmatprep.subr.mxu1 %v2720_v9  ;;  %1643 = vmatprep.subr.mxu0 %v2720_v9 }
 0x482   :  { %1528 = vmatpush1.msra.mxu1 %v2313_v51  ;;  %1644 = vmatpush1.msra.mxu0 %v2341_v3  ;;  %v709_v51 = vadd.f32 %v3471_v30, %v3624_v15  ;;  %v2348_v30 = vld [vmem:[%s3884_s6 + $0x3f0] sm:$0xff] }
 0x483   :  { %1529 = vmatprep.subr.mxu1 %v2720_v9  ;;  %1645 = vmatprep.subr.mxu0 %v2720_v9 }
 0x484   :  { %1530 = vmatpush1.msra.mxu1 %v2312_v52  ;;  %1646 = vmatpush1.msra.mxu0 %v2340_v53 }
 0x485   :  { %1531 = vmatprep.subr.mxu1 %v2720_v9  ;;  %1647 = vmatprep.subr.mxu0 %v2720_v9 }
 0x486   :  { %1532 = vmatpush1.msra.mxu1 %v2311_v55  ;;  %1648 = vmatpush1.msra.mxu0 %v2339_v56 }
 0x487   :  { %1533 = vmatprep.subr.mxu1 %v2720_v9  ;;  %1649 = vmatprep.subr.mxu0 %v2720_v9 }
 0x488   :  { %1534 = vmatpush1.msra.mxu1 %v2310_v57  ;;  %1650 = vmatpush1.msra.mxu0 %v2338_v59 }
 0x489   :  { %1535 = vmatprep.subr.mxu1 %v2720_v9  ;;  %1651 = vmatprep.subr.mxu0 %v2720_v9 }
 0x48a   :  { %1536 = vmatpush1.msra.mxu1 %v2309_v60  ;;  %1652 = vmatpush1.msra.mxu0 %v2337_v61 }
 0x48b   :  { %1537 = vmatprep.subr.mxu1 %v2720_v9  ;;  %1653 = vmatprep.subr.mxu0 %v2720_v9 }
 0x48c   :  { %1538 = vmatpush1.msra.mxu1 %v2308_v62  ;;  %1654 = vmatpush1.msra.mxu0 %v2336_v63 }
 0x48d   :  { %1539 = vmatprep.subr.mxu1 %v2720_v9  ;;  %1655 = vmatprep.subr.mxu0 %v2720_v9 }
 0x48e   :  { %1540 = vmatpush1.msra.mxu1 %v2307_v0  ;;  %1656 = vmatpush1.msra.mxu0 %v2335_v2 }
 0x48f   :  { %1541 = vmatprep.subr.mxu1 %v2720_v9  ;;  %1657 = vmatprep.subr.mxu0 %v2720_v9 }
 0x490   :  { %1542 = vmatpush1.msra.mxu1 %v2306_v5  ;;  %1658 = vmatpush1.msra.mxu0 %v2334_v6 }
 0x491   :  { %1543 = vmatprep.subr.mxu1 %v2720_v9  ;;  %1659 = vmatprep.subr.mxu0 %v2720_v9 }
 0x492   :  { %1544 = vmatpush1.msra.mxu1 %v2305_v7  ;;  %1660 = vmatpush1.msra.mxu0 %v2333_v10 }
 0x493   :  { %1545 = vmatprep.subr.mxu1 %v2720_v9  ;;  %1661 = vmatprep.subr.mxu0 %v2720_v9 }
 0x494   :  { %1546 = vmatpush1.msra.mxu1 %v2304_v12  ;;  %1662 = vmatpush1.msra.mxu0 %v2332_v13 }
 0x495   :  { %1567 = vmatprep.subr.mxu1 %v2720_v9  ;;  %1683 = vmatprep.subr.mxu0 %v2720_v9 }
 0x496   :  { %1684 = vmatpush2.msra.mxu0 %v2353_v14  ;;  %1568 = vmatpush2.msra.mxu1 %v2325_v19 }
 0x497   :  { %1685 = vmatprep.subr.mxu0 %v2720_v9  ;;  %1569 = vmatprep.subr.mxu1 %v2720_v9 }
 0x498   :  { %1686 = vmatpush2.msra.mxu0 %v2352_v25  ;;  %1570 = vmatpush2.msra.mxu1 %v2324_v23 }
 0x499   :  { %1687 = vmatprep.subr.mxu0 %v2720_v9  ;;  %1571 = vmatprep.subr.mxu1 %v2720_v9 }
 0x49a   :  { %1572 = vmatpush2.msra.mxu1 %v2323_v28  ;;  %1688 = vmatpush2.msra.mxu0 %v2351_v42  ;;  %v1469_v28 = vsel %vm308_vm7, 0.0, %v3092_v4 }
 0x49b   :  { %1573 = vmatprep.subr.mxu1 %v2720_v9  ;;  %1689 = vmatprep.subr.mxu0 %v2720_v9 }
 0x49c   :  { %1690 = vmatpush2.msra.mxu0 %v2350_v44 }
 0x49d   :  { %1691 = vmatprep.subr.mxu0 %v2720_v9 }
 0x533   :  { %v2499_v24 = vpop.f32.mrf.mxu1  ;;  %v2513_v26 = vpop.f32.mrf.mxu0 }
 0x534   :  { %v1283_v48 = vadd.f32 %v2499_v24, %v3629_v16  ;;  %v1385_v33 = vadd.f32 %v2513_v26, %v2299_v17 }
 0x535   :  { %v1277_v36 = vpop.f32.mrf.mxu1  ;;  %v1379_v37 = vpop.f32.mrf.mxu0 }
 0x536   :  { %v3651_v38 = vadd.f32 %v1283_v48, %v699_v27  ;;  %v1399_v39 = vadd.f32 %v1385_v33, %v3328_v49  ;;  %v1278_v40 = vadd.f32 %v3629_v16, %v1277_v36  ;;  %v1380_v41 = vadd.f32 %v2299_v17, %v1379_v37  ;;  %v2322_v49 = vld [vmem:[%s3884_s6 + $0x350] sm:$0xff] }
 0x537   :  { %1574 = vmatpush2.msra.mxu1 %v2322_v49 }
 0x538   :  { %v1403_v29 = vmul.f32 %v1399_v39, %v2999_v1  ;;  %v3662_v43 = vadd.f32 %v1278_v40, %v694_v35  ;;  %v1398_v50 = vadd.f32 %v1380_v41, %v3343_v11  ;;  %v2349_v11 = vld [vmem:[%s3884_s6 + $0x3f8] sm:$0xff]  ;;  %1575 = vmatprep.subr.mxu1 %v2720_v9 }
 0x539   :  { %1576 = vmatpush2.msra.mxu1 %v2321_v45  ;;  %1692 = vmatpush2.msra.mxu0 %v2349_v11 }
 0x53a   :  { %v1402_v46 = vmul.f32 %v1398_v50, %v2970_v54  ;;  %v1468_v47 = vsel %vm308_vm7, %v1403_v29, %v3026_v20  ;;  %v2320_v20 = vld [vmem:[%s3884_s6 + $0x340] sm:$0xff]  ;;  %v1412_v59 = vrot.slane %v1403_v29, 4  ;;  %1693 = vmatprep.subr.mxu0 %v2720_v9  ;;  %1577 = vmatprep.subr.mxu1 %v2720_v9 }
 0x53b   :  { %v2502_v3 = vpop.f32.mrf.mxu1  ;;  %v2516_v52 = vpop.f32.mrf.mxu0  ;;  %2328 = vmatprep.mubr.msk.f32.mxu1 %vm356_vm9, %v1468_v47  ;;  %2356 = vmatprep.mubr.msk.f32.mxu0 %vm356_vm9, %v1468_v47 }
 0x53c   :  { %v1410_v53 = vrot.slane %v1402_v46, 4  ;;  %v1293_v55 = vadd.f32 %v2502_v3, %v3629_v16  ;;  %v1395_v56 = vadd.f32 %v2516_v52, %v2299_v17  ;;  %v2609_v57 = vpack.i.bf16 %v1403_v29, %v1402_v46  ;;  %1578 = vmatpush2.msra.mxu1 %v2320_v20  ;;  %1694 = vmatpush2.msra.mxu0 %v2348_v30  ;;  %v1868_v20 = vld [vmem:[%s3888_s10 + $0x10] sm:$0xff] }
 0x53d   :  { %v1389_v60 = vpop.f32.mrf.mxu0  ;;  %v1418_v9 = vsel %vm824_vm13, %v1412_v59, %v3404_v32  ;;  %v1471_v52 = vsel %vm308_vm7, 0.0, %v3117_v34  ;;  %v2365_v34 = vld [vmem:[%s3886_s8 + $0xa8] sm:$0xff]  ;;  %v3764_v30 = vpop.f32.mrf.mxu1 }
 0x53e   :  { %v3697_v61 = vadd.f32 %v1293_v55, %v709_v51  ;;  %v1390_v62 = vadd.f32 %v2299_v17, %v1389_v60  ;;  %2610 = vrot.lane.b32.xlu1 %v2609_v57, %s2722_s30  ;;  %v1411_v63 = vsel %vm824_vm13, %v3404_v32, %v1410_v53  ;;  %v1413_v0 = vsel %vm824_vm13, %v1410_v53, %v1412_v59  ;;  %v2367_v53 = vld [vmem:[%s3886_s8 + $0xb8] sm:$0xff]  ;;  %v2366_v55 = vld [vmem:[%s3886_s8 + $0xb0] sm:$0xff]  ;;  %v2355_v59 = vld [vmem:[%s3885_s7 + $0x5] ss:$0 sm:$0xff] }
 0x53f   :  { %v1401_v2 = vadd.f32 %v1395_v56, %v3382_v18  ;;  %v2614_v6 = vpack.i.bf16 %v1413_v0, %v1411_v63  ;;  %v2619_v12 = vpack.i.bf16 %v1418_v9, %v1413_v0  ;;  %2517 = vmatprep.subr.mxu1 %v2367_v53  ;;  %v2364_v56 = vld [vmem:[%s3886_s8 + $0xa0] sm:$0xff]  ;;  %v1869_v57 = vld [vmem:[%s3888_s10 + $0x18] sm:$0xff] }
 0x540   :  { %v1400_v5 = vadd.f32 %v1390_v62, %v3376_v22  ;;  %2531 = vmatprep.subr.mxu0 %v1869_v57 }
 0x541   :  { %2615 = vrot.lane.b32.xlu0 %v2614_v6, %s2721_s21  ;;  %v1405_v10 = vmul.f32 %v1401_v2, %v3012_v8 }
 0x542   :  { %v1404_v7 = vmul.f32 %v1400_v5, %v2981_v58 }
 0x543   :  { %v1416_v22 = vrot.slane %v1405_v10, 4  ;;  %v1470_v11 = vsel %vm308_vm7, %v1405_v10, %v3104_v21 }
 0x544   :  { %v1414_v13 = vrot.slane %v1404_v7, 4 }
 0x545   :  { %2620 = vrot.lane.b32.xlu0 %v2619_v12, %s2723_s13  ;;  %v1419_v17 = vsel %vm824_vm13, %v1416_v22, %v3404_v32 }
 0x546   :  { %v1415_v14 = vsel %vm824_vm13, %v3404_v32, %v1414_v13  ;;  %v1417_v18 = vsel %vm824_vm13, %v1414_v13, %v1416_v22 }
 0x547   :  { %1424 = vrot.lane.b32.xlu1 %v1415_v14, %s2721_s21 }
 0x549   :  { %1436 = vrot.lane.b32.xlu0 %v1404_v7, %s2722_s30 }
 0x54b   :  { %1448 = vrot.lane.b32.xlu1 %v1417_v18, %s2723_s13 }
 0x54d   :  { %1426 = vrot.lane.b32.xlu0 %v1417_v18, %s2721_s21 }
 0x54f   :  { %1438 = vrot.lane.b32.xlu1 %v1405_v10, %s2722_s30 }
 0x551   :  { %1450 = vrot.lane.b32.xlu0 %v1419_v17, %s2723_s13 }
 0x5b0   :  { %v2611_v23 = vpop.permute.xlu1 %2610 }
 0x5b1   :  { %v2612_v27 = vunpack.i.l.bf16 %v2611_v23  ;;  %v2613_v32 = vunpack.i.h.bf16 %v2611_v23 }
 0x5b3   :  { %v2616_v19 = vpop.permute.xlu0 %2615 }
 0x5b4   :  { %v2617_v25 = vunpack.i.l.bf16 %v2616_v19  ;;  %v2618_v24 = vunpack.i.h.bf16 %v2616_v19 }
 0x5b6   :  { %v1456_v26 = vsel %vm308_vm7, 0.0, %v2617_v25  ;;  %v1457_v40 = vsel %vm308_vm7, %v1402_v46, %v2618_v24 }
 0x5b7   :  { %v2621_v48 = vpop.permute.xlu0 %2620  ;;  %v1460_v36 = vsel %vm313_vm11, %v1456_v26, %v2612_v27  ;;  %v1461_v50 = vsel %vm313_vm11, %v1457_v40, %v2613_v32  ;;  %v2327_v26 = vld [vmem:[%s3885_s7 + $0x4] ss:$0 sm:$0xff] }
 0x5b8   :  { %v2622_v33 = vunpack.i.l.bf16 %v2621_v48  ;;  %v2623_v37 = vunpack.i.h.bf16 %v2621_v48 }
 0x5b9   :  { %v1425_v35 = vpop.permute.xlu1 %1424 }
 0x5ba   :  { %v1464_v39 = vsel %vm318_vm12, %v1460_v36, %v2622_v33  ;;  %v1458_v42 = vsel %vm308_vm7, 0.0, %v1425_v35  ;;  %v1465_v49 = vsel %vm318_vm12, %v1461_v50, %v2623_v37 }
 0x5bb   :  { %v1437_v41 = vpop.permute.xlu0 %1436  ;;  %1580 = vmatmul.mubr.f32.vlgmr.msra.gmra.mxu1 %v1464_v39  ;;  %1696 = vmatmul.mubr.f32.vlgmr.msra.gmra.mxu0 %v1464_v39 }
 0x5bc   :  { %2329 = vmatprep.mubr.msk.f32.mxu1 %vm356_vm9, %v1469_v28  ;;  %2357 = vmatprep.mubr.msk.f32.mxu0 %vm356_vm9, %v1469_v28  ;;  %v1462_v44 = vsel %vm313_vm11, %v1458_v42, %v1437_v41 }
 0x5bd   :  { %v1449_v29 = vpop.permute.xlu1 %1448  ;;  %2518 = vmatpush3.msra.mxu1 %v2367_v53  ;;  %2532 = vmatpush3.msra.mxu0 %v1869_v57  ;;  %v1867_v57 = vld [vmem:[%s3888_s10 + $0x8] sm:$0xff] }
 0x5be   :  { %v1466_v47 = vsel %vm318_vm12, %v1462_v44, %v1449_v29  ;;  %2519 = vmatprep.subr.mxu1 %v2366_v55  ;;  %2533 = vmatprep.subr.mxu0 %v1868_v20 }
 0x5bf   :  { %v1427_v45 = vpop.permute.xlu0 %1426  ;;  %1585 = vmatmul.mubr.f32.gmra.mxu1 %v1465_v49  ;;  %1701 = vmatmul.mubr.f32.gmra.mxu0 %v1465_v49 }
 0x5c0   :  { %v1459_v4 = vsel %vm308_vm7, %v1404_v7, %v1427_v45  ;;  %2330 = vmatprep.mubr.msk.f32.mxu1 %vm356_vm9, %v1470_v11  ;;  %2358 = vmatprep.mubr.msk.f32.mxu0 %vm356_vm9, %v1470_v11 }
 0x5c1   :  { %v1439_v46 = vpop.permute.xlu1 %1438  ;;  %2520 = vmatpush3.msra.mxu1 %v2366_v55  ;;  %2534 = vmatpush3.msra.mxu0 %v1868_v20  ;;  %v2381_v20 = vld [vmem:[%s3888_s10 + $0x30] sm:$0xff] }
 0x5c2   :  { %v1463_v51 = vsel %vm313_vm11, %v1459_v4, %v1439_v46  ;;  %2521 = vmatprep.subr.mxu1 %v2365_v34  ;;  %2535 = vmatprep.subr.mxu0 %v1867_v57 }
 0x5c3   :  { %v1451_v3 = vpop.permute.xlu0 %1450  ;;  %1590 = vmatmul.mubr.f32.gmra.mxu1 %v1466_v47  ;;  %1706 = vmatmul.mubr.f32.gmra.mxu0 %v1466_v47 }
 0x5c4   :  { %2331 = vmatprep.mubr.msk.f32.mxu1 %vm356_vm9, %v1471_v52  ;;  %2359 = vmatprep.mubr.msk.f32.mxu0 %vm356_vm9, %v1471_v52  ;;  %v1467_v21 = vsel %vm318_vm12, %v1463_v51, %v1451_v3 }
 0x5c5   :  { %2522 = vmatpush3.msra.mxu1 %v2365_v34  ;;  %2536 = vmatpush3.msra.mxu0 %v1867_v57 }
 0x5c6   :  { %2523 = vmatprep.subr.mxu1 %v2364_v56 }
 0x5c7   :  { %1595 = vmatmul.mubr.f32.gmra.mxu1 %v1467_v21  ;;  %1711 = vmatmul.mubr.f32.gmra.mxu0 %v1467_v21 }
 0x5c8   :  { %2524 = vmatpush3.msra.mxu1 %v2364_v56  ;;  %v2382_v56 = vld [vmem:[%s3888_s10 + $0x38] sm:$0xff] }
 0x5c9   :  { %2545 = vmatprep.subr.mxu1 %v2382_v56 }
 0x67b   :  { %v1581_v60 = vpop.f32.mrf.mxu1  ;;  %v1697_v62 = vpop.f32.mrf.mxu0 }
 0x67c   :  { %v1698_v63 = vadd.f32 %v2355_v59, %v1697_v62  ;;  %v1582_v36 = vadd.f32 %v2327_v26, %v1581_v60  ;;  %v2380_v60 = vld [vmem:[%s3888_s10 + $0x28] sm:$0xff]  ;;  %v2379_v62 = vld [vmem:[%s3888_s10 + $0x20] sm:$0xff] }
 0x67d   :  { %v1583_v0 = vpop.f32.mrf.mxu1  ;;  %v1699_v2 = vpop.f32.mrf.mxu0 }
 0x67e   :  { %v2360_v5 = vmul.f32 -1.442695, %v1698_v63  ;;  %v2369_v63 = vld [vmem:[%s3887_s9 + $0x5] ss:$0 sm:$0xff] }
 0x67f   :  { %v1586_v6 = vpop.f32.mrf.mxu1  ;;  %v1702_v7 = vpop.f32.mrf.mxu0 }
 0x680   :  { %2672 = vpow2.f32 %v2360_v5  ;;  %v1703_v9 = vadd.f32 %v2355_v59, %v1702_v7  ;;  %v1587_v40 = vadd.f32 %v2327_v26, %v1586_v6 }
 0x681   :  { %v1588_v10 = vpop.f32.mrf.mxu1  ;;  %v1704_v12 = vpop.f32.mrf.mxu0 }
 0x682   :  { %v2361_v13 = vmul.f32 -1.442695, %v1703_v9  ;;  %v1288_v10 = vadd.f32 %v3629_v16, %v3764_v30 }
 0x683   :  { %v1591_v14 = vpop.f32.mrf.mxu1  ;;  %v1707_v22 = vpop.f32.mrf.mxu0 }
 0x684   :  { %2674 = vpow2.f32 %v2361_v13  ;;  %v1708_v18 = vadd.f32 %v2355_v59, %v1707_v22  ;;  %v1592_v28 = vadd.f32 %v2327_v26, %v1591_v14  ;;  %v704_v22 = vadd.f32 %v3624_v15, %v3473_v31  ;;  %v2374_v31 = vld [vmem:[%s3889_s11] ss:$0 sm:$0xff]  ;;  %v2384_v15 = vld [vmem:[%s3889_s11 + $0x1] ss:$0 sm:$0xff]  ;;  %s2725_s11 = smov 16  }
 0x685   :  { %v1593_v17 = vpop.f32.mrf.mxu1  ;;  %v1709_v19 = vpop.f32.mrf.mxu0 }
 0x686   :  { %v2362_v23 = vmul.f32 -1.442695, %v1708_v18 }
 0x687   :  { %v1596_v25 = vpop.f32.mrf.mxu1  ;;  %v1712_v24 = vpop.f32.mrf.mxu0 }
 0x688   :  { %2676 = vpow2.f32 %v2362_v23  ;;  %v1713_v27 = vadd.f32 %v2355_v59, %v1712_v24  ;;  %v1597_v50 = vadd.f32 %v2327_v26, %v1596_v25  ;;  %v1866_v59 = vld [vmem:[%s3888_s10] sm:$0xff] }
 0x689   :  { %v1598_v48 = vpop.f32.mrf.mxu1  ;;  %v1714_v33 = vpop.f32.mrf.mxu0  ;;  %2537 = vmatprep.subr.mxu0 %v1866_v59 }
 0x68a   :  { %v2363_v35 = vmul.f32 -1.442695, %v1713_v27  ;;  %2538 = vmatpush3.msra.mxu0 %v1866_v59 }
 0x68c   :  { %2678 = vpow2.f32 %v2363_v35 }
 0x68d   :  { %v2673_v37 = vpop.eup %2672  ;;  %2680 = vtanh.f32 %v1582_v36 }
 0x68e   :  { %v1732_v39 = vadd.f32 1.0, %v2673_v37 }
 0x690   :  { %2682 = vrcp.f32 %v1732_v39 }
 0x691   :  { %v2675_v32 = vpop.eup %2674  ;;  %2684 = vtanh.f32 %v1587_v40 }
 0x692   :  { %v1733_v41 = vadd.f32 1.0, %v2675_v32 }
 0x694   :  { %2686 = vrcp.f32 %v1733_v41 }
 0x695   :  { %v2677_v42 = vpop.eup %2676  ;;  %2688 = vtanh.f32 %v1592_v28 }
 0x696   :  { %v1734_v29 = vadd.f32 1.0, %v2677_v42 }
 0x698   :  { %2690 = vrcp.f32 %v1734_v29 }
 0x699   :  { %v2679_v49 = vpop.eup %2678  ;;  %2692 = vtanh.f32 %v1597_v50 }
 0x69a   :  { %v1735_v44 = vadd.f32 1.0, %v2679_v49  ;;  %v2681_v45 = vpop.eup %2680 }
 0x69c   :  { %2694 = vrcp.f32 %v1735_v44 }
 0x69d   :  { %v2683_v11 = vpop.eup %2682 }
 0x69e   :  { %v1744_v4 = vmul.f32 %v2683_v11, %v2681_v45  ;;  %v2685_v46 = vpop.eup %2684 }
 0x6a0   :  { %2525 = vmatprep.mubr.msk.f32.mxu1 %vm308_vm7, %v1744_v4 }
 0x6a1   :  { %v2687_v47 = vpop.eup %2686 }
 0x6a2   :  { %v1745_v51 = vmul.f32 %v2687_v47, %v2685_v46  ;;  %v2689_v3 = vpop.eup %2688 }
 0x6a4   :  { %2526 = vmatmul.mubr.msk.f32.vlgmr.msra.gmra.mxu1 %vm308_vm7, %v1745_v51 }
 0x6a5   :  { %v2691_v52 = vpop.eup %2690  ;;  %2546 = vmatpush3.msra.mxu1 %v2382_v56 }
 0x6a6   :  { %v1746_v21 = vmul.f32 %v2691_v52, %v2689_v3  ;;  %v2693_v53 = vpop.eup %2692  ;;  %2547 = vmatprep.subr.mxu1 %v2381_v20 }
 0x6a7   :  { %2548 = vmatpush3.msra.mxu1 %v2381_v20 }
 0x6a8   :  { %2528 = vmatprep.mubr.msk.f32.mxu1 %vm308_vm7, %v1746_v21  ;;  %2549 = vmatprep.subr.mxu1 %v2380_v60  ;;  %v2081_v21 = vld [vmem:[%s3881_s3 + $0x8] sm:$0xff] }
 0x6a9   :  { %v2695_v55 = vpop.eup %2694  ;;  %2550 = vmatpush3.msra.mxu1 %v2380_v60  ;;  %v2083_v60 = vld [vmem:[%s3881_s3 + $0x18] sm:$0xff] }
 0x6aa   :  { %v1747_v34 = vmul.f32 %v2695_v55, %v2693_v53  ;;  %2551 = vmatprep.subr.mxu1 %v2379_v62  ;;  %v2080_v55 = vld [vmem:[%s3881_s3] sm:$0xff] }
 0x6ab   :  { %2552 = vmatpush3.msra.mxu1 %v2379_v62 }
 0x6ac   :  { %2529 = vmatmul.mubr.msk.f32.gmra.mxu1 %vm308_vm7, %v1747_v34 }
 0x764   :  { %v2527_v0 = vpop.f32.mrf.mxu1 }
 0x765   :  { %v1845_v2 = vadd.f32 %v2527_v0, %v2369_v63 }
 0x766   :  { %v1839_v5 = vpop.f32.mrf.mxu1 }
 0x767   :  { %v1840_v6 = vadd.f32 %v2369_v63, %v1839_v5  ;;  %v1859_v7 = vadd.f32 %v1845_v2, %v3651_v38  ;;  %v1298_v38 = vadd.f32 %v1288_v10, %v704_v22 }
 0x769   :  { %v1858_v9 = vadd.f32 %v1840_v6, %v3662_v43  ;;  %v1863_v13 = vmul.f32 %v1859_v7, %v2999_v1 }
 0x76b   :  { %v1862_v12 = vmul.f32 %v1858_v9, %v2970_v54 }
 0x76c   :  { %v2530_v14 = vpop.f32.mrf.mxu1 }
 0x76d   :  { %v1855_v18 = vadd.f32 %v2530_v14, %v2369_v63  ;;  %2539 = vmatprep.mubr.msk.f32.mxu0 %vm308_vm7, %v1862_v12  ;;  %2553 = vmatprep.mubr.msk.f32.mxu1 %vm308_vm7, %v1862_v12 }
 0x76e   :  { %v1849_v17 = vpop.f32.mrf.mxu1  ;;  %2540 = vmatmul.mubr.msk.f32.vlgmr.msra.gmra.mxu0 %vm308_vm7, %v1863_v13  ;;  %2554 = vmatmul.mubr.msk.f32.vlgmr.msra.gmra.mxu1 %vm308_vm7, %v1863_v13 }
 0x76f   :  { %v1850_v16 = vadd.f32 %v2369_v63, %v1849_v17  ;;  %v1861_v43 = vadd.f32 %v1855_v18, %v3697_v61  ;;  %v2082_v63 = vld [vmem:[%s3881_s3 + $0x10] sm:$0xff] }
 0x771   :  { %v1860_v30 = vadd.f32 %v1850_v16, %v1298_v38  ;;  %v1865_v23 = vmul.f32 %v1861_v43, %v3012_v8 }
 0x773   :  { %v1864_v19 = vmul.f32 %v1860_v30, %v2981_v58 }
 0x775   :  { %2542 = vmatprep.mubr.msk.f32.mxu0 %vm308_vm7, %v1864_v19  ;;  %2556 = vmatprep.mubr.msk.f32.mxu1 %vm308_vm7, %v1864_v19 }
 0x776   :  { %2543 = vmatmul.mubr.msk.f32.gmra.mxu0 %vm308_vm7, %v1865_v23  ;;  %2557 = vmatmul.mubr.msk.f32.gmra.mxu1 %vm308_vm7, %v1865_v23 }
 0x82e   :  { %v2541_v61 = vpop.f32.mrf.mxu0  ;;  %v2555_v25 = vpop.f32.mrf.mxu1 }
 0x82f   :  { %v1961_v24 = vadd.f32 %v2541_v61, %v2374_v31  ;;  %v2063_v26 = vadd.f32 %v2555_v25, %v2384_v15 }
 0x830   :  { %v1955_v27 = vpop.f32.mrf.mxu0  ;;  %v2057_v48 = vpop.f32.mrf.mxu1 }
 0x831   :  { %v1975_v33 = vmul.f32 %v1961_v24, %v2999_v1  ;;  %v2077_v35 = vmul.f32 %v2063_v26, %v2999_v1  ;;  %v1956_v36 = vadd.f32 %v2374_v31, %v1955_v27  ;;  %v2058_v37 = vadd.f32 %v2384_v15, %v2057_v48 }
 0x833   :  { %v2086_v39 = vmul.f32 1.442695, %v2077_v35  ;;  %v1974_v40 = vmul.f32 %v1956_v36, %v2970_v54  ;;  %v2076_v32 = vmul.f32 %v2058_v37, %v2970_v54  ;;  %2110 = vrot.lane.b32.xlu0 %v1975_v33, %s2724_s24 }
 0x835   :  { %2696 = vpow2.f32 %v2086_v39  ;;  %v2084_v41 = vmul.f32 1.442695, %v2076_v32  ;;  %2108 = vrot.lane.b32.xlu1 %v1974_v40, %s2724_s24 }
 0x836   :  { %v2544_v28 = vpop.f32.mrf.mxu0  ;;  %v2558_v42 = vpop.f32.mrf.mxu1 }
 0x837   :  { %2698 = vpow2.f32 %v2084_v41  ;;  %v1971_v29 = vadd.f32 %v2544_v28, %v2374_v31  ;;  %v2073_v50 = vadd.f32 %v2558_v42, %v2384_v15  ;;  %2126 = vrot.lane.b32.xlu0 %v2077_v35, %s2725_s11 }
 0x838   :  { %v1965_v49 = vpop.f32.mrf.mxu0  ;;  %v2067_v44 = vpop.f32.mrf.mxu1 }
 0x839   :  { %v1977_v45 = vmul.f32 %v1971_v29, %v3012_v8  ;;  %v2079_v11 = vmul.f32 %v2073_v50, %v3012_v8  ;;  %v1966_v4 = vadd.f32 %v2374_v31, %v1965_v49  ;;  %v2068_v46 = vadd.f32 %v2384_v15, %v2067_v44  ;;  %2124 = vrot.lane.b32.xlu1 %v2076_v32, %s2725_s11 }
 0x83b   :  { %v2090_v47 = vmul.f32 1.442695, %v2079_v11  ;;  %v1976_v51 = vmul.f32 %v1966_v4, %v2981_v58  ;;  %v2078_v3 = vmul.f32 %v2068_v46, %v2981_v58  ;;  %2114 = vrot.lane.b32.xlu0 %v1977_v45, %s2724_s24 }
 0x83d   :  { %2700 = vpow2.f32 %v2090_v47  ;;  %v2088_v52 = vmul.f32 1.442695, %v2078_v3  ;;  %2112 = vrot.lane.b32.xlu1 %v1976_v51, %s2724_s24 }
 0x83f   :  { %2702 = vpow2.f32 %v2088_v52  ;;  %2130 = vrot.lane.b32.xlu0 %v2079_v11, %s2725_s11 }
 0x841   :  { %2128 = vrot.lane.b32.xlu1 %v2078_v3, %s2725_s11 }
 0x842   :  { %v2697_v53 = vpop.eup %2696 }
 0x843   :  { %v2093_v34 = vmul.f32 %v2697_v53, %v2081_v21 }
 0x844   :  { %v2699_v56 = vpop.eup %2698 }
 0x845   :  { %v2097_v57 = vadd.f32 %v2093_v34, %v1975_v33  ;;  %v2092_v20 = vmul.f32 %v2699_v56, %v2080_v55 }
 0x847   :  { %v2096_v59 = vadd.f32 %v2092_v20, %v1974_v40  ;;  %v2101_v10 = vmul.f32 %v2097_v57, %v2999_v1 }
 0x849   :  { %v2100_v14 = vmul.f32 %v2096_v59, %v2970_v54 }
 0x84a   :  { %v2701_v62 = vpop.eup %2700 }
 0x84b   :  { %v2095_v0 = vmul.f32 %v2701_v62, %v2083_v60 }
 0x84c   :  { %v2703_v2 = vpop.eup %2702 }
 0x84d   :  { %v2099_v5 = vadd.f32 %v2095_v0, %v1977_v45  ;;  %v2094_v6 = vmul.f32 %v2703_v2, %v2082_v63 }
 0x84f   :  { %v2098_v7 = vadd.f32 %v2094_v6, %v1976_v51 }
 0x851   :  { %v2102_v25 = vmul.f32 %v2098_v7, %v2981_v58 }
 0x8a5   :  { %v2111_v9 = vpop.permute.xlu0 %2110 }
 0x8a6   :  { %v2138_v13 = vsel %vm2136_vm14, %v2101_v10, %v2111_v9 }
 0x8a7   :  { %v2109_v12 = vpop.permute.xlu1 %2108 }
 0x8a8   :  { %v2137_v17 = vsel %vm2136_vm14, %v2100_v14, %v2109_v12 }
 0x8a9   :  { %v2127_v22 = vpop.permute.xlu0 %2126 }
 0x8aa   :  { %v2142_v18 = vsel %vm77_vm0, %v2138_v13, %v2127_v22 }
 0x8ab   :  { %v2147_v38 = vsel %vm2145_vm15, %v2142_v18, %v2999_v1  ;;  %v2125_v16 = vpop.permute.xlu1 %2124  ;;  %v2103_v1 = vmul.f32 %v2099_v5, %v3012_v8 }
 0x8ac   :  { %v2151_v43 = vsel %vm308_vm7, %v2147_v38, 0.0  ;;  %v2141_v30 = vsel %vm77_vm0, %v2137_v17, %v2125_v16 }
 0x8ad   :  { %2155 = vst [vmem:[%s3890_s12 + $0x8] sm:$0xff] %v2151_v43  ;;  %v2146_v19 = vsel %vm2145_vm15, %v2141_v30, %v2970_v54  ;;  %v2115_v23 = vpop.permute.xlu0 %2114 }
 0x8ae   :  { %v2150_v31 = vsel %vm308_vm7, %v2146_v19, 0.0  ;;  %v2140_v61 = vsel %vm2136_vm14, %v2103_v1, %v2115_v23 }
 0x8af   :  { %2154 = vst [vmem:[%s3890_s12] sm:$0xff] %v2150_v31  ;;  %v2113_v15 = vpop.permute.xlu1 %2112 }
 0x8b0   :  { %v2139_v27 = vsel %vm2136_vm14, %v2102_v25, %v2113_v15 }
 0x8b1   :  { %v2131_v24 = vpop.permute.xlu0 %2130 }
 0x8b2   :  { %v2144_v26 = vsel %vm77_vm0, %v2140_v61, %v2131_v24 }
 0x8b3   :  { %v2149_v54 = vsel %vm2145_vm15, %v2144_v26, %v3012_v8  ;;  %v2129_v48 = vpop.permute.xlu1 %2128 }
 0x8b4   :  { %v2153_v33 = vsel %vm308_vm7, %v2149_v54, 0.0  ;;  %v2143_v35 = vsel %vm77_vm0, %v2139_v27, %v2129_v48 }
 0x8b5   :  { %2157 = vst [vmem:[%s3890_s12 + $0x18] sm:$0xff] %v2153_v33  ;;  %v2148_v36 = vsel %vm2145_vm15, %v2143_v35, %v2981_v58 }
 0x8b6   :  { %v2152_v37 = vsel %vm308_vm7, %v2148_v36, 0.0 }
 0x8b7   :  { %2156 = vst [vmem:[%s3890_s12 + $0x10] sm:$0xff] %v2152_v37 }

</bundles_post_ra>
